<compile_context>
chip_gen: v7x
topology: tpu7x:2x2x1
jax: 0.10.0
libtpu: 0.0.40
codegen_flags: <defaults>
</compile_context>

<pallas_src>
import numpy as np
import jax
import jax.numpy as jnp
from jax.experimental import pallas as pl
from jax.experimental.pallas import tpu as pltpu

# ---------------- module configuration ----------------
INPLANES = 128
PLANES = 64
CARDINALITY = 8
EXPANSION = 2
MID = CARDINALITY * (PLANES // 32)      # 16  (mid_planes)
COUT = PLANES * EXPANSION               # 128 (== INPLANES so identity residual works)
CPG = MID // CARDINALITY                # 2   (channels per group)
EPS = 1e-5

# input spatial shape (NCDHW): (N, INPLANES, D, H, W)
N, D, H, W = 2, 4, 8, 8

DP, HP = D + 2, H + 2                   # d/h zero-halo; w stays unpadded (it lives on lanes)
DH = DP * HP                            # 60 (d,h) rows per sample

# lane-dense layout: rows = (d, h), lanes = (w, channel)
XL = W * INPLANES                       # 1024 input lanes
ML = W * MID                            # 128  mid lanes
OL = W * COUT                           # 1024 output lanes
K2 = 9 * ML                             # 1152 stacked-K for the grouped 3x3x3 conv

F = 6                                   # front pad rows -> OUT_START is 8-aligned
OUT_START = F + HP                      # 16 : first computed row (d=1, h=0)
OUT_ROWS = D * HP                       # 40 : whole d-slabs 1..D (h halo rows sliced off later)
R_TOT = 72                              # padded row count (covers max tap offset +/- (HP+1))
assert OUT_START - (HP + 1) >= 0
assert OUT_START + OUT_ROWS + (HP + 1) <= R_TOT
assert OUT_START % 8 == 0 and OUT_ROWS % 8 == 0 and R_TOT % 8 == 0


# ---------------- the Pallas kernel (one batch sample per grid step) ----------------
def bottleneck_kernel(x_ref, w1_ref, b1_ref, w2_ref, b2_ref, w3_ref, b3_ref,
                      o_ref, t1_ref, im_ref):
    # conv1 (1x1x1, BN1 scale pre-folded, w-block-diagonal) + bias + ReLU.
    # The d/h halo mask is generated in-kernel from the row index (float math only,
    # no integer div/mod): row r -> q = r + HP - F, d+1 = floor(q/HP), h = q - HP*(d+1).
    rows = jax.lax.broadcasted_iota(jnp.int32, (R_TOT, ML), 0).astype(jnp.float32)
    q = rows + float(HP - F)
    d1 = jnp.floor(q * (1.0 / HP))
    h = q - d1 * HP
    valid = (d1 >= 2.0) & (d1 <= float(D + 1)) & (h >= 1.0) & (h <= float(H))

    t1 = jnp.dot(x_ref[...], w1_ref[...], preferred_element_type=jnp.float32)
    t1 = jnp.maximum(t1 + b1_ref[...], 0.0)
    # Zero rows act as the d/h zero-padding for conv2 below.
    t1_ref[...] = jnp.where(valid, t1, 0.0)

    # conv2 (grouped 3x3x3, BN2 scale pre-folded): stacked-K im2col over the 9 (kd,kh)
    # row shifts.  The kw shift and the w zero-padding are folded into the w-banded
    # weight matrix, so every im2col store is a full 128-lane store and the conv is a
    # single K=1152 MXU matmul with a 128-lane-wide output.
    for kd in range(3):
        for kh in range(3):
            j = kd * 3 + kh
            off = (kd - 1) * HP + (kh - 1)
            im_ref[:, j * ML:(j + 1) * ML] = (
                t1_ref[pl.ds(OUT_START + off, OUT_ROWS), :].astype(jnp.bfloat16))
    t2 = jnp.dot(im_ref[...], w2_ref[...], preferred_element_type=jnp.float32)
    t2 = jnp.maximum(t2 + b2_ref[...], 0.0).astype(jnp.bfloat16)

    # conv3 (1x1x1, BN3 scale pre-folded, w-block-diagonal) + bias, identity residual,
    # final ReLU.  Output block is exactly the computed window: one full-width store.
    t3 = jnp.dot(t2, w3_ref[...], preferred_element_type=jnp.float32) + b3_ref[...]
    res = x_ref[pl.ds(OUT_START, OUT_ROWS), :].astype(jnp.float32)
    o_ref[...] = jnp.maximum(t3 + res, 0.0)


# ---------------- parameter folding (wrapper-side, done once) ----------------
def _fold_bn(gamma, beta, mean, var):
    s = gamma / jnp.sqrt(var + EPS)
    return s, beta - mean * s


def prepare_params(params):
    """Fold eval-mode BN into the conv weights, expand them to the lane-dense
    (w-on-lanes) layout and cast to bf16 for the MXU."""
    s1, b1 = _fold_bn(*params['bn1'])
    s2, b2 = _fold_bn(*params['bn2'])
    s3, b3 = _fold_bn(*params['bn3'])
    s1, b1, s2, b2, s3, b3 = [np.asarray(a, np.float32)
                              for a in (s1, b1, s2, b2, s3, b3)]

    w1 = np.asarray(params['w1'], np.float32)[:, :, 0, 0, 0].T * s1[None, :]   # (CIN, MID)
    w3 = np.asarray(params['w3'], np.float32)[:, :, 0, 0, 0].T * s3[None, :]   # (MID, COUT)

    # Per-tap grouped-conv (cin, cout) block-diagonal matrices, BN2 scale folded.
    w2 = np.asarray(params['w2'], np.float32)                                  # (MID, CPG, 3,3,3)
    bd = np.zeros((3, 3, 3, MID, MID), np.float32)
    for co in range(MID):
        g = co // CPG
        for i in range(CPG):
            bd[:, :, :, g * CPG + i, co] = w2[co, i]
    bd *= s2[None, None, None, None, :]

    # Fold W onto lanes: block-diagonal (conv1/conv3) and w-banded (conv2) expansions.
    eye_w = np.eye(W, dtype=np.float32)
    w1big = np.kron(eye_w, w1)                    # (W*CIN, W*MID)  = (1024, 128)
    w3big = np.kron(eye_w, w3)                    # (W*MID, W*COUT) = (128, 1024)
    w2big = np.zeros((9, ML, ML), np.float32)     # (9, 128, 128) -> (1152, 128)
    for kd in range(3):
        for kh in range(3):
            j = kd * 3 + kh
            for wo in range(W):
                for kw in range(3):
                    wi = wo + kw - 1
                    if 0 <= wi < W:               # w zero-padding = absent band entries
                        w2big[j, wi * MID:(wi + 1) * MID,
                              wo * MID:(wo + 1) * MID] = bd[kd, kh, kw]
    w2big = w2big.reshape(K2, ML)

    return {
        'w1': jnp.asarray(w1big, jnp.bfloat16),
        'w2': jnp.asarray(w2big, jnp.bfloat16),
        'w3': jnp.asarray(w3big, jnp.bfloat16),
        'b1': jnp.asarray(np.tile(b1, W)[None, :], jnp.float32),   # (1, ML)
        'b2': jnp.asarray(np.tile(b2, W)[None, :], jnp.float32),   # (1, ML)
        'b3': jnp.asarray(np.tile(b3, W)[None, :], jnp.float32),   # (1, OL)
    }


# ---------------- forward wrapper ----------------
def resnext_bottleneck_forward(x, prep):
    """x: (N, INPLANES, D, H, W) float32 (PyTorch NCDHW). Returns NCDHW output."""
    n = x.shape[0]
    x_cl = jnp.transpose(x, (0, 2, 3, 4, 1))                        # (N, D, H, W, C)
    x_cl = jnp.pad(x_cl, ((0, 0), (1, 1), (1, 1), (0, 0), (0, 0)))  # d/h zero halo
    x_rows = x_cl.reshape(n, DH, XL)                                # rows=(d,h), lanes=(w,c)
    x_rows = jnp.pad(x_rows, ((0, 0), (F, R_TOT - F - DH), (0, 0)))
    x_rows = x_rows.astype(jnp.bfloat16)                            # halves the input DMA

    grid_spec = pltpu.PrefetchScalarGridSpec(
        num_scalar_prefetch=0,
        grid=(n,),
        in_specs=[
            pl.BlockSpec((None, R_TOT, XL), lambda i: (i, 0, 0)),
            pl.BlockSpec((XL, ML), lambda i: (0, 0)),
            pl.BlockSpec((1, ML), lambda i: (0, 0)),
            pl.BlockSpec((K2, ML), lambda i: (0, 0)),
            pl.BlockSpec((1, ML), lambda i: (0, 0)),
            pl.BlockSpec((ML, OL), lambda i: (0, 0)),
            pl.BlockSpec((1, OL), lambda i: (0, 0)),
        ],
        out_specs=pl.BlockSpec((None, OUT_ROWS, OL), lambda i: (i, 0, 0)),
        scratch_shapes=[pltpu.VMEM((R_TOT, ML), jnp.float32),       # t1 (post conv1/BN1/ReLU)
                        pltpu.VMEM((OUT_ROWS, K2), jnp.bfloat16)],  # stacked-K im2col
    )
    out = pl.pallas_call(
        bottleneck_kernel,
        out_shape=jax.ShapeDtypeStruct((n, OUT_ROWS, OL), jnp.float32),
        grid_spec=grid_spec,
        compiler_params=pltpu.CompilerParams(
            dimension_semantics=("parallel",)),
    )(x_rows, prep['w1'], prep['b1'], prep['w2'], prep['b2'],
      prep['w3'], prep['b3'])

    # Output rows are whole d-slabs 1..D with the h halo attached; slice h, go NCDHW.
    out = out.reshape(n, D, HP, W, COUT)[:, :, 1:1 + H, :, :]
    return jnp.transpose(out, (0, 4, 1, 2, 3))


# ---------------- deterministic parameter init ----------------
def init_params(key):
    ks = jax.random.split(key, 6)

    def bn(k, c):
        k1, k2, k3, k4 = jax.random.split(k, 4)
        gamma = 1.0 + 0.1 * jax.random.normal(k1, (c,), jnp.float32)
        beta = 0.1 * jax.random.normal(k2, (c,), jnp.float32)
        mean = 0.1 * jax.random.normal(k3, (c,), jnp.float32)
        var = 0.5 + jax.random.uniform(k4, (c,), jnp.float32)
        return gamma, beta, mean, var

    return {
        'w1': jax.random.normal(ks[0], (MID, INPLANES, 1, 1, 1), jnp.float32)
              / np.sqrt(INPLANES),
        'w2': jax.random.normal(ks[1], (MID, CPG, 3, 3, 3), jnp.float32)
              / np.sqrt(CPG * 27),
        'w3': jax.random.normal(ks[2], (COUT, MID, 1, 1, 1), jnp.float32)
              / np.sqrt(MID),
        'bn1': bn(ks[3], MID),
        'bn2': bn(ks[4], MID),
        'bn3': bn(ks[5], COUT),
    }


# ---------------- pure-JAX reference (mirrors the PyTorch forward) ----------------
def reference_forward(x, params):
    dn = ('NCDHW', 'OIDHW', 'NCDHW')

    def conv(v, w, groups=1, padding='VALID'):
        return jax.lax.conv_general_dilated(
            v, w, window_strides=(1, 1, 1), padding=padding,
            dimension_numbers=dn, feature_group_count=groups,
            precision=jax.lax.Precision.HIGHEST)

    def bn(v, stats):
        s, b = _fold_bn(*stats)
        return v * s.reshape(1, -1, 1, 1, 1) + b.reshape(1, -1, 1, 1, 1)

    out = jax.nn.relu(bn(conv(x, params['w1']), params['bn1']))
    out = jax.nn.relu(bn(conv(out, params['w2'], groups=CARDINALITY,
                              padding=[(1, 1)] * 3), params['bn2']))
    out = bn(conv(out, params['w3']), params['bn3'])
    return jax.nn.relu(out + x)


if __name__ == "__main__":
    key = jax.random.PRNGKey(0)
    kx, kp = jax.random.split(key)
    x = jax.random.normal(kx, (N, INPLANES, D, H, W), jnp.float32)
    params = init_params(kp)

    prep = prepare_params(params)
    fwd = jax.jit(resnext_bottleneck_forward)
    out = jax.block_until_ready(fwd(x, prep))
    assert out.shape == (N, COUT, D, H, W), out.shape

    ref = np.asarray(reference_forward(x, params))
    got = np.asarray(out)
    max_err = float(np.max(np.abs(got - ref)))
    # Tolerance: bf16 MXU operands with BN scales folded BEFORE the bf16 cast, plus a
    # bf16-rounded residual source (the review's recommendation); typical max|err| is
    # ~1e-2..2e-2, atol gives headroom where the reference is near zero.
    if not np.allclose(got, ref, atol=4e-2, rtol=3e-2):
        raise AssertionError(f"Pallas kernel mismatch vs reference, max|err|={max_err}")

    print("KERNEL_OK")
</pallas_src>

<mosaic_0001>
module attributes {stable_mosaic.version = 11 : i64} {
  func.func @bottleneck_kernel(%arg0: i32, %arg1: memref<1x72x1024xbf16, #tpu.memory_space<vmem>>, %arg2: memref<1024x128xbf16, #tpu.memory_space<vmem>>, %arg3: memref<1x128xf32, #tpu.memory_space<vmem>>, %arg4: memref<1152x128xbf16, #tpu.memory_space<vmem>>, %arg5: memref<1x128xf32, #tpu.memory_space<vmem>>, %arg6: memref<128x1024xbf16, #tpu.memory_space<vmem>>, %arg7: memref<1x1024xf32, #tpu.memory_space<vmem>>, %arg8: memref<1x40x1024xf32, #tpu.memory_space<vmem>>, %arg9: memref<72x128xf32, #tpu.memory_space<vmem>>, %arg10: memref<40x1152xbf16, #tpu.memory_space<vmem>>) attributes {dimension_semantics = [#tpu.dimension_semantics<parallel>], iteration_bounds = array<i64: 2>, scalar_prefetch = 0 : i64, scratch_operands = 2 : i64, tpu.core_type = #tpu.core_type<tc>, window_params = [{transform_indices = @transform_0, window_bounds = array<i64: 1, 72, 1024>}, {pipeline_mode = #tpu.pipeline_mode<synchronous>, transform_indices = @transform_1, window_bounds = array<i64: 1024, 128>}, {pipeline_mode = #tpu.pipeline_mode<synchronous>, transform_indices = @transform_2, window_bounds = array<i64: 1, 128>}, {pipeline_mode = #tpu.pipeline_mode<synchronous>, transform_indices = @transform_3, window_bounds = array<i64: 1152, 128>}, {pipeline_mode = #tpu.pipeline_mode<synchronous>, transform_indices = @transform_4, window_bounds = array<i64: 1, 128>}, {pipeline_mode = #tpu.pipeline_mode<synchronous>, transform_indices = @transform_5, window_bounds = array<i64: 128, 1024>}, {pipeline_mode = #tpu.pipeline_mode<synchronous>, transform_indices = @transform_6, window_bounds = array<i64: 1, 1024>}, {transform_indices = @transform_7, window_bounds = array<i64: 1, 40, 1024>}]} {
    %0 = tpu.iota {dimensions = array<i32: 0>} : vector<72x128xi32>
    %1 = arith.sitofp %0 : vector<72x128xi32> to vector<72x128xf32>
    %cst = arith.constant 4.000000e+00 : f32
    %2 = vector.broadcast %cst : f32 to vector<72x128xf32>
    %3 = arith.addf %1, %2 : vector<72x128xf32>
    %cst_0 = arith.constant 1.000000e-01 : f32
    %4 = vector.broadcast %cst_0 : f32 to vector<72x128xf32>
    %5 = arith.mulf %3, %4 : vector<72x128xf32>
    %6 = math.floor %5 : vector<72x128xf32>
    %cst_1 = arith.constant 1.000000e+01 : f32
    %7 = vector.broadcast %cst_1 : f32 to vector<72x128xf32>
    %8 = arith.mulf %6, %7 : vector<72x128xf32>
    %9 = arith.subf %3, %8 : vector<72x128xf32>
    %cst_2 = arith.constant 2.000000e+00 : f32
    %10 = vector.broadcast %cst_2 : f32 to vector<72x128xf32>
    %11 = arith.cmpf oge, %6, %10 : vector<72x128xf32>
    %cst_3 = arith.constant 5.000000e+00 : f32
    %12 = vector.broadcast %cst_3 : f32 to vector<72x128xf32>
    %13 = arith.cmpf ole, %6, %12 : vector<72x128xf32>
    %14 = arith.andi %11, %13 : vector<72x128xi1>
    %cst_4 = arith.constant 1.000000e+00 : f32
    %15 = vector.broadcast %cst_4 : f32 to vector<72x128xf32>
    %16 = arith.cmpf oge, %9, %15 : vector<72x128xf32>
    %17 = arith.andi %14, %16 : vector<72x128xi1>
    %cst_5 = arith.constant 8.000000e+00 : f32
    %18 = vector.broadcast %cst_5 : f32 to vector<72x128xf32>
    %19 = arith.cmpf ole, %9, %18 : vector<72x128xf32>
    %20 = arith.andi %17, %19 : vector<72x128xi1>
    %c0 = arith.constant 0 : index
    %c0_6 = arith.constant 0 : index
    %c0_7 = arith.constant 0 : index
    %21 = vector.load %arg1[%c0, %c0_6, %c0_7] : memref<1x72x1024xbf16, #tpu.memory_space<vmem>>, vector<1x72x1024xbf16>
    %22 = vector.shape_cast %21 : vector<1x72x1024xbf16> to vector<72x1024xbf16>
    %c0_8 = arith.constant 0 : index
    %c0_9 = arith.constant 0 : index
    %23 = vector.load %arg2[%c0_8, %c0_9] : memref<1024x128xbf16, #tpu.memory_space<vmem>>, vector<1024x128xbf16>
    %cst_10 = arith.constant dense<0.000000e+00> : vector<72x128xf32>
    %24 = tpu.matmul %22, %23, %cst_10 {dimension_numbers = #tpu.dot_dimension_numbers<[1], [0], [0], [1], [0, 0, 1, 1], [], []>} : vector<72x1024xbf16>, vector<1024x128xbf16>, vector<72x128xf32> -> vector<72x128xf32>
    %c0_11 = arith.constant 0 : index
    %c0_12 = arith.constant 0 : index
    %25 = vector.load %arg3[%c0_11, %c0_12] : memref<1x128xf32, #tpu.memory_space<vmem>>, vector<1x128xf32>
    %26 = vector.broadcast %25 : vector<1x128xf32> to vector<72x128xf32>
    %27 = arith.addf %24, %26 : vector<72x128xf32>
    %cst_13 = arith.constant 0.000000e+00 : f32
    %28 = vector.broadcast %cst_13 : f32 to vector<72x128xf32>
    %29 = arith.maximumf %27, %28 : vector<72x128xf32>
    %cst_14 = arith.constant 0.000000e+00 : f32
    %30 = vector.broadcast %cst_14 : f32 to vector<72x128xf32>
    %31 = arith.select %20, %29, %30 : vector<72x128xi1>, vector<72x128xf32>
    %c0_15 = arith.constant 0 : index
    %c0_16 = arith.constant 0 : index
    %32 = vector.load %arg9[%c0_15, %c0_16] : memref<72x128xf32, #tpu.memory_space<vmem>>, vector<72x128xf32>
    tpu.vector_store %arg9[%c0_15, %c0_16], %31 {strides = array<i32>} : memref<72x128xf32, #tpu.memory_space<vmem>>, vector<72x128xf32>,
    %c5 = arith.constant 5 : index
    %c0_17 = arith.constant 0 : index
    %33 = vector.load %arg9[%c5, %c0_17] : memref<72x128xf32, #tpu.memory_space<vmem>>, vector<40x128xf32>
    %34 = arith.truncf %33 : vector<40x128xf32> to vector<40x128xbf16>
    %c0_18 = arith.constant 0 : index
    %c0_19 = arith.constant 0 : index
    %35 = vector.load %arg10[%c0_18, %c0_19] : memref<40x1152xbf16, #tpu.memory_space<vmem>>, vector<40x128xbf16>
    tpu.vector_store %arg10[%c0_18, %c0_19], %34 {strides = array<i32>} : memref<40x1152xbf16, #tpu.memory_space<vmem>>, vector<40x128xbf16>,
    %c6 = arith.constant 6 : index
    %c0_20 = arith.constant 0 : index
    %36 = vector.load %arg9[%c6, %c0_20] : memref<72x128xf32, #tpu.memory_space<vmem>>, vector<40x128xf32>
    %37 = arith.truncf %36 : vector<40x128xf32> to vector<40x128xbf16>
    %c0_21 = arith.constant 0 : index
    %c128 = arith.constant 128 : index
    %38 = vector.load %arg10[%c0_21, %c128] : memref<40x1152xbf16, #tpu.memory_space<vmem>>, vector<40x128xbf16>
    tpu.vector_store %arg10[%c0_21, %c128], %37 {strides = array<i32>} : memref<40x1152xbf16, #tpu.memory_space<vmem>>, vector<40x128xbf16>,
    %c7 = arith.constant 7 : index
    %c0_22 = arith.constant 0 : index
    %39 = vector.load %arg9[%c7, %c0_22] : memref<72x128xf32, #tpu.memory_space<vmem>>, vector<40x128xf32>
    %40 = arith.truncf %39 : vector<40x128xf32> to vector<40x128xbf16>
    %c0_23 = arith.constant 0 : index
    %c256 = arith.constant 256 : index
    %41 = vector.load %arg10[%c0_23, %c256] : memref<40x1152xbf16, #tpu.memory_space<vmem>>, vector<40x128xbf16>
    tpu.vector_store %arg10[%c0_23, %c256], %40 {strides = array<i32>} : memref<40x1152xbf16, #tpu.memory_space<vmem>>, vector<40x128xbf16>,
    %c15 = arith.constant 15 : index
    %c0_24 = arith.constant 0 : index
    %42 = vector.load %arg9[%c15, %c0_24] : memref<72x128xf32, #tpu.memory_space<vmem>>, vector<40x128xf32>
    %43 = arith.truncf %42 : vector<40x128xf32> to vector<40x128xbf16>
    %c0_25 = arith.constant 0 : index
    %c384 = arith.constant 384 : index
    %44 = vector.load %arg10[%c0_25, %c384] : memref<40x1152xbf16, #tpu.memory_space<vmem>>, vector<40x128xbf16>
    tpu.vector_store %arg10[%c0_25, %c384], %43 {strides = array<i32>} : memref<40x1152xbf16, #tpu.memory_space<vmem>>, vector<40x128xbf16>,
    %c16 = arith.constant 16 : index
    %c0_26 = arith.constant 0 : index
    %45 = vector.load %arg9[%c16, %c0_26] : memref<72x128xf32, #tpu.memory_space<vmem>>, vector<40x128xf32>
    %46 = arith.truncf %45 : vector<40x128xf32> to vector<40x128xbf16>
    %c0_27 = arith.constant 0 : index
    %c512 = arith.constant 512 : index
    %47 = vector.load %arg10[%c0_27, %c512] : memref<40x1152xbf16, #tpu.memory_space<vmem>>, vector<40x128xbf16>
    tpu.vector_store %arg10[%c0_27, %c512], %46 {strides = array<i32>} : memref<40x1152xbf16, #tpu.memory_space<vmem>>, vector<40x128xbf16>,
    %c17 = arith.constant 17 : index
    %c0_28 = arith.constant 0 : index
    %48 = vector.load %arg9[%c17, %c0_28] : memref<72x128xf32, #tpu.memory_space<vmem>>, vector<40x128xf32>
    %49 = arith.truncf %48 : vector<40x128xf32> to vector<40x128xbf16>
    %c0_29 = arith.constant 0 : index
    %c640 = arith.constant 640 : index
    %50 = vector.load %arg10[%c0_29, %c640] : memref<40x1152xbf16, #tpu.memory_space<vmem>>, vector<40x128xbf16>
    tpu.vector_store %arg10[%c0_29, %c640], %49 {strides = array<i32>} : memref<40x1152xbf16, #tpu.memory_space<vmem>>, vector<40x128xbf16>,
    %c25 = arith.constant 25 : index
    %c0_30 = arith.constant 0 : index
    %51 = vector.load %arg9[%c25, %c0_30] : memref<72x128xf32, #tpu.memory_space<vmem>>, vector<40x128xf32>
    %52 = arith.truncf %51 : vector<40x128xf32> to vector<40x128xbf16>
    %c0_31 = arith.constant 0 : index
    %c768 = arith.constant 768 : index
    %53 = vector.load %arg10[%c0_31, %c768] : memref<40x1152xbf16, #tpu.memory_space<vmem>>, vector<40x128xbf16>
    tpu.vector_store %arg10[%c0_31, %c768], %52 {strides = array<i32>} : memref<40x1152xbf16, #tpu.memory_space<vmem>>, vector<40x128xbf16>,
    %c26 = arith.constant 26 : index
    %c0_32 = arith.constant 0 : index
    %54 = vector.load %arg9[%c26, %c0_32] : memref<72x128xf32, #tpu.memory_space<vmem>>, vector<40x128xf32>
    %55 = arith.truncf %54 : vector<40x128xf32> to vector<40x128xbf16>
    %c0_33 = arith.constant 0 : index
    %c896 = arith.constant 896 : index
    %56 = vector.load %arg10[%c0_33, %c896] : memref<40x1152xbf16, #tpu.memory_space<vmem>>, vector<40x128xbf16>
    tpu.vector_store %arg10[%c0_33, %c896], %55 {strides = array<i32>} : memref<40x1152xbf16, #tpu.memory_space<vmem>>, vector<40x128xbf16>,
    %c27 = arith.constant 27 : index
    %c0_34 = arith.constant 0 : index
    %57 = vector.load %arg9[%c27, %c0_34] : memref<72x128xf32, #tpu.memory_space<vmem>>, vector<40x128xf32>
    %58 = arith.truncf %57 : vector<40x128xf32> to vector<40x128xbf16>
    %c0_35 = arith.constant 0 : index
    %c1024 = arith.constant 1024 : index
    %59 = vector.load %arg10[%c0_35, %c1024] : memref<40x1152xbf16, #tpu.memory_space<vmem>>, vector<40x128xbf16>
    tpu.vector_store %arg10[%c0_35, %c1024], %58 {strides = array<i32>} : memref<40x1152xbf16, #tpu.memory_space<vmem>>, vector<40x128xbf16>,
    %c0_36 = arith.constant 0 : index
    %c0_37 = arith.constant 0 : index
    %60 = vector.load %arg10[%c0_36, %c0_37] : memref<40x1152xbf16, #tpu.memory_space<vmem>>, vector<40x1152xbf16>
    %c0_38 = arith.constant 0 : index
    %c0_39 = arith.constant 0 : index
    %61 = vector.load %arg4[%c0_38, %c0_39] : memref<1152x128xbf16, #tpu.memory_space<vmem>>, vector<1152x128xbf16>
    %cst_40 = arith.constant dense<0.000000e+00> : vector<40x128xf32>
    %62 = tpu.matmul %60, %61, %cst_40 {dimension_numbers = #tpu.dot_dimension_numbers<[1], [0], [0], [1], [0, 0, 1, 1], [], []>} : vector<40x1152xbf16>, vector<1152x128xbf16>, vector<40x128xf32> -> vector<40x128xf32>
    %c0_41 = arith.constant 0 : index
    %c0_42 = arith.constant 0 : index
    %63 = vector.load %arg5[%c0_41, %c0_42] : memref<1x128xf32, #tpu.memory_space<vmem>>, vector<1x128xf32>
    %64 = vector.broadcast %63 : vector<1x128xf32> to vector<40x128xf32>
    %65 = arith.addf %62, %64 : vector<40x128xf32>
    %cst_43 = arith.constant 0.000000e+00 : f32
    %66 = vector.broadcast %cst_43 : f32 to vector<40x128xf32>
    %67 = arith.maximumf %65, %66 : vector<40x128xf32>
    %68 = arith.truncf %67 : vector<40x128xf32> to vector<40x128xbf16>
    %c0_44 = arith.constant 0 : index
    %c0_45 = arith.constant 0 : index
    %69 = vector.load %arg6[%c0_44, %c0_45] : memref<128x1024xbf16, #tpu.memory_space<vmem>>, vector<128x1024xbf16>
    %cst_46 = arith.constant dense<0.000000e+00> : vector<40x1024xf32>
    %70 = tpu.matmul %68, %69, %cst_46 {dimension_numbers = #tpu.dot_dimension_numbers<[1], [0], [0], [1], [0, 0, 1, 1], [], []>} : vector<40x128xbf16>, vector<128x1024xbf16>, vector<40x1024xf32> -> vector<40x1024xf32>
    %c0_47 = arith.constant 0 : index
    %c0_48 = arith.constant 0 : index
    %71 = vector.load %arg7[%c0_47, %c0_48] : memref<1x1024xf32, #tpu.memory_space<vmem>>, vector<1x1024xf32>
    %72 = vector.broadcast %71 : vector<1x1024xf32> to vector<40x1024xf32>
    %73 = arith.addf %70, %72 : vector<40x1024xf32>
    %c0_49 = arith.constant 0 : index
    %c16_50 = arith.constant 16 : index
    %c0_51 = arith.constant 0 : index
    %74 = vector.load %arg1[%c0_49, %c16_50, %c0_51] : memref<1x72x1024xbf16, #tpu.memory_space<vmem>>, vector<1x40x1024xbf16>
    %75 = vector.shape_cast %74 : vector<1x40x1024xbf16> to vector<40x1024xbf16>
    %76 = arith.extf %75 : vector<40x1024xbf16> to vector<40x1024xf32>
    %77 = arith.addf %73, %76 : vector<40x1024xf32>
    %cst_52 = arith.constant 0.000000e+00 : f32
    %78 = vector.broadcast %cst_52 : f32 to vector<40x1024xf32>
    %79 = arith.maximumf %77, %78 : vector<40x1024xf32>
    %c0_53 = arith.constant 0 : index
    %c0_54 = arith.constant 0 : index
    %c0_55 = arith.constant 0 : index
    %80 = vector.load %arg8[%c0_53, %c0_54, %c0_55] : memref<1x40x1024xf32, #tpu.memory_space<vmem>>, vector<1x40x1024xf32>
    %81 = vector.shape_cast %80 : vector<1x40x1024xf32> to vector<40x1024xf32>
    %82 = vector.shape_cast %79 : vector<40x1024xf32> to vector<1x40x1024xf32>
    tpu.vector_store %arg8[%c0_53, %c0_54, %c0_55], %82 {strides = array<i32>} : memref<1x40x1024xf32, #tpu.memory_space<vmem>>, vector<1x40x1024xf32>,
    return
  }
  func.func @transform_0(%arg0: i32) -> (i32, i32, i32) {
    %c0_i32 = arith.constant 0 : i32
    %c0_i32_0 = arith.constant 0 : i32
    %c0_i32_1 = arith.constant 0 : i32
    return %arg0, %c0_i32, %c0_i32_0 : i32, i32, i32
  }
  func.func @transform_1(%arg0: i32) -> (i32, i32) {
    %c0_i32 = arith.constant 0 : i32
    %c0_i32_0 = arith.constant 0 : i32
    %c0_i32_1 = arith.constant 0 : i32
    return %c0_i32, %c0_i32_0 : i32, i32
  }
  func.func @transform_2(%arg0: i32) -> (i32, i32) {
    %c0_i32 = arith.constant 0 : i32
    %c0_i32_0 = arith.constant 0 : i32
    %c0_i32_1 = arith.constant 0 : i32
    return %c0_i32, %c0_i32_0 : i32, i32
  }
  func.func @transform_3(%arg0: i32) -> (i32, i32) {
    %c0_i32 = arith.constant 0 : i32
    %c0_i32_0 = arith.constant 0 : i32
    %c0_i32_1 = arith.constant 0 : i32
    return %c0_i32, %c0_i32_0 : i32, i32
  }
  func.func @transform_4(%arg0: i32) -> (i32, i32) {
    %c0_i32 = arith.constant 0 : i32
    %c0_i32_0 = arith.constant 0 : i32
    %c0_i32_1 = arith.constant 0 : i32
    return %c0_i32, %c0_i32_0 : i32, i32
  }
  func.func @transform_5(%arg0: i32) -> (i32, i32) {
    %c0_i32 = arith.constant 0 : i32
    %c0_i32_0 = arith.constant 0 : i32
    %c0_i32_1 = arith.constant 0 : i32
    return %c0_i32, %c0_i32_0 : i32, i32
  }
  func.func @transform_6(%arg0: i32) -> (i32, i32) {
    %c0_i32 = arith.constant 0 : i32
    %c0_i32_0 = arith.constant 0 : i32
    %c0_i32_1 = arith.constant 0 : i32
    return %c0_i32, %c0_i32_0 : i32, i32
  }
  func.func @transform_7(%arg0: i32) -> (i32, i32, i32) {
    %c0_i32 = arith.constant 0 : i32
    %c0_i32_0 = arith.constant 0 : i32
    %c0_i32_1 = arith.constant 0 : i32
    return %arg0, %c0_i32, %c0_i32_0 : i32, i32, i32
  }
}

</mosaic_0001>

<bundles_post_ra>
// kernel: resnext_bottleneck_forward.1
= control target key start
LH: loop header
LB: loop body
LE: loop exit
PB: predicated region body
PF: predicated region fallthrough
CT: control target
= control target key end

     0   :  { %s4654_s24 = smov 0   ;;  %s5871_s0 = inlined_call_operand.vmem [shape: bf16[2,72,1024], index: 0, kind: input, shape index: {}]   ;;  %s5872_s1 = inlined_call_operand.vmem [shape: bf16[1024,128], index: 1, kind: input, shape index: {}]   ;;  %s5873_s2 = inlined_call_operand.vmem [shape: f32[1,128], index: 2, kind: input, shape index: {}]   ;;  %s5874_s3 = inlined_call_operand.vmem [shape: bf16[1152,128], index: 3, kind: input, shape index: {}]   ;;  %s5875_s4 = inlined_call_operand.vmem [shape: f32[1,128], index: 4, kind: input, shape index: {}]   ;;  %s5876_s5 = inlined_call_operand.vmem [shape: bf16[128,1024], index: 5, kind: input, shape index: {}]   ;;  %s5877_s6 = inlined_call_operand.vmem [shape: f32[1,1024], index: 6, kind: input, shape index: {}]   ;;  %s5878_s7 = inlined_call_operand.vmem [shape: f32[2,40,1024], index: 7, kind: output, shape index: {}]  }
   0x1 LB: > { %s3669_s25 = sadd.s32 4294967295, %s4609_s24   ;;  %p3673_p0 = scmp.ge.s32.totalorder %s4609_s24, 1  ;;  %s4609_s24 = sphi %s4654_s24, %s17_s24  }
   0x2   : > { %p237_p1 = scmp.lt.s32.totalorder %s4609_s24, 3 }
   0x4   : > { %p238_p2 = pnand %p3673_p0, %p237_p1 }
   0x5   : > { %v4425_v0 = vld [vmem:[%s5872_s1 + $0x40] sm:$0xff] (!%p238_p2)   ;;  %v4429_v4 = vld [vmem:[%s5872_s1 + $0x48] sm:$0xff] (!%p238_p2)   ;;  %v4433_v8 = vld [vmem:[%s5872_s1 + $0x50] sm:$0xff] (!%p238_p2)   ;;  %p269_p3 = scmp.lt.s32.totalorder (!%p238_p2), %s3669_s25, 1 }
   0x6   : > { %241 = sbr.rel (%p238_p2) target bundleno = 910 (0x38e), region = 48  ;;  %v4426_v1 = vld [vmem:[%s5872_s1 + $0xc0] sm:$0xff] (!%p238_p2)   ;;  %4037 = vmatprep.subr.bf16.mxu0 (!%p238_p2), %v4425_v0  ;;  %v4430_v5 = vld [vmem:[%s5872_s1 + $0xc8] sm:$0xff] (!%p238_p2)   ;;  %v4434_v9 = vld [vmem:[%s5872_s1 + $0xd0] sm:$0xff] (!%p238_p2)  }
   0x7   : > { %v4427_v2 = vld [vmem:[%s5872_s1] sm:$0xff] (!%p238_p2)   ;;  %4083 = vmatprep.subr.bf16.mxu1 (!%p238_p2), %v4426_v1  ;;  %v4431_v6 = vld [vmem:[%s5872_s1 + $0x8] sm:$0xff] (!%p238_p2)   ;;  %v4435_v10 = vld [vmem:[%s5872_s1 + $0x10] sm:$0xff] (!%p238_p2)  }
   0x8   : > { %v4428_v3 = vld [vmem:[%s5872_s1 + $0x80] sm:$0xff] (!%p238_p2)   ;;  %4038 = vmatpush3.bf16.msra.mxu0 (!%p238_p2), %v4427_v2  ;;  %v4432_v7 = vld [vmem:[%s5872_s1 + $0x88] sm:$0xff] (!%p238_p2)   ;;  %v4436_v11 = vld [vmem:[%s5872_s1 + $0x90] sm:$0xff] (!%p238_p2)  }
   0x9   : > { %4084 = vmatpush3.bf16.msra.mxu1 (!%p238_p2), %v4428_v3  ;;  %4039 = vmatprep.subr.bf16.mxu0 (!%p238_p2), %v4429_v4  ;;  %v4437_v12 = vld [vmem:[%s5872_s1 + $0x58] sm:$0xff] (!%p238_p2)   ;;  %v4441_v16 = vld [vmem:[%s5872_s1 + $0x60] sm:$0xff] (!%p238_p2)   ;;  %v4445_v20 = vld [vmem:[%s5872_s1 + $0x68] sm:$0xff] (!%p238_p2)  }
   0xa   : > { %4085 = vmatprep.subr.bf16.mxu1 (!%p238_p2), %v4430_v5  ;;  %v4438_v13 = vld [vmem:[%s5872_s1 + $0xd8] sm:$0xff] (!%p238_p2)   ;;  %v4442_v17 = vld [vmem:[%s5872_s1 + $0xe0] sm:$0xff] (!%p238_p2)   ;;  %v4446_v21 = vld [vmem:[%s5872_s1 + $0xe8] sm:$0xff] (!%p238_p2)  }
   0xb   : > { %v4439_v14 = vld [vmem:[%s5872_s1 + $0x18] sm:$0xff] (!%p238_p2)   ;;  %v4443_v18 = vld [vmem:[%s5872_s1 + $0x20] sm:$0xff] (!%p238_p2)   ;;  %v4447_v22 = vld [vmem:[%s5872_s1 + $0x28] sm:$0xff] (!%p238_p2)  }
   0xc   : > { %4040 = vmatpush3.bf16.msra.mxu0 (!%p238_p2), %v4431_v6  ;;  %v4440_v15 = vld [vmem:[%s5872_s1 + $0x98] sm:$0xff] (!%p238_p2)   ;;  %v4444_v19 = vld [vmem:[%s5872_s1 + $0xa0] sm:$0xff] (!%p238_p2)   ;;  %v4448_v23 = vld [vmem:[%s5872_s1 + $0xa8] sm:$0xff] (!%p238_p2)  }
   0xd   : > { %4086 = vmatpush3.bf16.msra.mxu1 %v4432_v7  ;;  %4041 = vmatprep.subr.bf16.mxu0 %v4433_v8  ;;  %s5928_s25 = smov (!%p269_p3, %s3669_s25), 1  ;;  %v4449_v24 = vld [vmem:[%s5872_s1 + $0x70] sm:$0xff]   ;;  %v4453_v28 = vld [vmem:[%s5872_s1 + $0x78] sm:$0xff]   ;;  %v4457_v40 = vld [vmem:[%s5872_s1 + $0x140] sm:$0xff]  }
   0xe   : > { %4087 = vmatprep.subr.bf16.mxu1 %v4434_v9  ;;  %v4450_v25 = vld [vmem:[%s5872_s1 + $0xf0] sm:$0xff]   ;;  %s4412_s13 = smul.u32 288, %s5928_s25  ;;  %v4454_v29 = vld [vmem:[%s5872_s1 + $0xf8] sm:$0xff]   ;;  %v4458_v41 = vld [vmem:[%s5872_s1 + $0x100] sm:$0xff]  }
   0xf   : > { %v4451_v26 = vld [vmem:[%s5872_s1 + $0x30] sm:$0xff]   ;;  %v4455_v30 = vld [vmem:[%s5872_s1 + $0x38] sm:$0xff]   ;;  %v4459_v42 = vld [vmem:[%s5872_s1 + $0x1c0] sm:$0xff]   ;;  %s4413_s10 = smul.u32 320, %s5928_s25 }
  0x10   : > { %4042 = vmatpush3.bf16.msra.mxu0 %v4435_v10  ;;  %v4452_v27 = vld [vmem:[%s5872_s1 + $0xb0] sm:$0xff]   ;;  %s4762_s26 = scalar_lea.vmem %s5871_s0, %s4412_s13  ;;  %v4456_v31 = vld [vmem:[%s5872_s1 + $0xb8] sm:$0xff]   ;;  %v4460_v43 = vld [vmem:[%s5872_s1 + $0x180] sm:$0xff]  }
  0x11   : > { %4088 = vmatpush3.bf16.msra.mxu1 %v4436_v11  ;;  %4043 = vmatprep.subr.bf16.mxu0 %v4437_v12  ;;  %v407_v32 = vld [vmem:[%s4762_s26] sm:$0xff]  ;;  %v408_v34 = vld [vmem:[%s4762_s26 + $0x8] sm:$0xff]  ;;  %v4465_v56 = vld [vmem:[%s5872_s1 + $0x150] sm:$0xff]   ;;  %s5760_s12 = scalar_lea.vmem %s5878_s7, %s4413_s10 }
  0x12   : > { %4089 = vmatprep.subr.bf16.mxu1 %v4438_v13  ;;  %v411_v33 = vld [vmem:[%s4762_s26 + $0x20] sm:$0xff]  ;;  %v412_v37 = vld [vmem:[%s4762_s26 + $0x28] sm:$0xff]  ;;  %v4466_v57 = vld [vmem:[%s5872_s1 + $0x110] sm:$0xff]  }
  0x13   : > { %v3677_v35 = vcombine.low %v407_v32, %v411_v33  ;;  %v3678_v36 = vcombine.high %v407_v32, %v411_v33  ;;  %v3679_v38 = vcombine.low %v408_v34, %v412_v37  ;;  %v3680_v39 = vcombine.high %v408_v34, %v412_v37  ;;  %v4461_v44 = vld [vmem:[%s5872_s1 + $0x148] sm:$0xff]   ;;  %v415_v46 = vld [vmem:[%s4762_s26 + $0x40] sm:$0xff]  ;;  %v4467_v58 = vld [vmem:[%s5872_s1 + $0x1d0] sm:$0xff]  }
  0x14   : > { %4044 = vmatpush3.bf16.msra.mxu0 %v4439_v14  ;;  %v4462_v45 = vld [vmem:[%s5872_s1 + $0x108] sm:$0xff]   ;;  %v419_v47 = vld [vmem:[%s4762_s26 + $0x60] sm:$0xff]  ;;  %v4468_v59 = vld [vmem:[%s5872_s1 + $0x190] sm:$0xff]  }
  0x15   : > { %4090 = vmatpush3.bf16.msra.mxu1 %v4440_v15  ;;  %4045 = vmatprep.subr.bf16.mxu0 %v4441_v16  ;;  %v3686_v48 = vcombine.high %v415_v46, %v419_v47  ;;  %v416_v49 = vld [vmem:[%s4762_s26 + $0x48] sm:$0xff]  ;;  %v3685_v51 = vcombine.low %v415_v46, %v419_v47  ;;  %v423_v60 = vld [vmem:[%s4762_s26 + $0x80] sm:$0xff]  ;;  %v4469_v2 = vld [vmem:[%s5872_s1 + $0x158] sm:$0xff]  }
  0x16   : > { %4091 = vmatprep.subr.bf16.mxu1 %v4442_v17  ;;  %1182 = vmatprep.mubr.bf16.mxu0 %v3678_v36  ;;  %v420_v50 = vld [vmem:[%s4762_s26 + $0x68] sm:$0xff]  ;;  %v427_v61 = vld [vmem:[%s4762_s26 + $0xa0] sm:$0xff]  ;;  %v4470_v5 = vld [vmem:[%s5872_s1 + $0x118] sm:$0xff]  }
  0x17   : > { %1254 = vmatprep.mubr.bf16.mxu1 %v3680_v39  ;;  %v3688_v52 = vcombine.high %v416_v49, %v420_v50  ;;  %v4463_v53 = vld [vmem:[%s5872_s1 + $0x1c8] sm:$0xff]   ;;  %v3687_v54 = vcombine.low %v416_v49, %v420_v50  ;;  %v3694_v0 = vcombine.high %v423_v60, %v427_v61  ;;  %v3693_v3 = vcombine.low %v423_v60, %v427_v61  ;;  %v4471_v6 = vld [vmem:[%s5872_s1 + $0x1d8] sm:$0xff]   ;;  %v4473_v8 = vld [vmem:[%s5872_s1 + $0x160] sm:$0xff]  }
  0x18   : > { %4046 = vmatpush3.bf16.msra.mxu0 %v4443_v18  ;;  %v4464_v55 = vld [vmem:[%s5872_s1 + $0x188] sm:$0xff]   ;;  %v4472_v7 = vld [vmem:[%s5872_s1 + $0x198] sm:$0xff]   ;;  %v4474_v9 = vld [vmem:[%s5872_s1 + $0x120] sm:$0xff]  }
  0x19   : > { %4092 = vmatpush3.bf16.msra.mxu1 %v4444_v19  ;;  %4047 = vmatprep.subr.bf16.mxu0 %v4445_v20  ;;  %v424_v62 = vld [vmem:[%s4762_s26 + $0x88] sm:$0xff]  ;;  %v4475_v10 = vld [vmem:[%s5872_s1 + $0x1e0] sm:$0xff]   ;;  %v4488_v33 = vld [vmem:[%s5872_s1 + $0x1b0] sm:$0xff]  }
  0x1a   : > { %4093 = vmatprep.subr.bf16.mxu1 %v4446_v21  ;;  %v428_v63 = vld [vmem:[%s4762_s26 + $0xa8] sm:$0xff]  ;;  %v431_v11 = vld [vmem:[%s4762_s26 + $0xc0] sm:$0xff]  ;;  %v4489_v34 = vld [vmem:[%s5872_s1 + $0x178] sm:$0xff]  }
  0x1b   : > { %v3696_v1 = vcombine.high %v424_v62, %v428_v63  ;;  %v3695_v4 = vcombine.low %v424_v62, %v428_v63  ;;  %v435_v12 = vld [vmem:[%s4762_s26 + $0xe0] sm:$0xff]  ;;  %v432_v13 = vld [vmem:[%s4762_s26 + $0xc8] sm:$0xff]  ;;  %v4491_v36 = vld [vmem:[%s5872_s1 + $0x1f8] sm:$0xff]  }
  0x1c   : > { %4048 = vmatpush3.bf16.msra.mxu0 %v4447_v22  ;;  %v3702_v14 = vcombine.high %v431_v11, %v435_v12  ;;  %v436_v15 = vld [vmem:[%s4762_s26 + $0xe8] sm:$0xff]  ;;  %v3701_v16 = vcombine.low %v431_v11, %v435_v12  ;;  %v4476_v18 = vld [vmem:[%s5872_s1 + $0x1a0] sm:$0xff]   ;;  %v4492_v37 = vld [vmem:[%s5872_s1 + $0x1b8] sm:$0xff]  }
  0x1d   : > { %4094 = vmatpush3.bf16.msra.mxu1 %v4448_v23  ;;  %4049 = vmatprep.subr.bf16.mxu0 %v4449_v24  ;;  %v3704_v17 = vcombine.high %v432_v13, %v436_v15  ;;  %v3703_v19 = vcombine.low %v432_v13, %v436_v15  ;;  %v4477_v20 = vld [vmem:[%s5872_s1 + $0x168] sm:$0xff]   ;;  %v4481_v24 = vld [vmem:[%s5872_s1 + $0x170] sm:$0xff]   ;;  %v418_v47 = vld [vmem:[%s4762_s26 + $0x58] sm:$0xff] }
  0x1e   : > { %4095 = vmatprep.subr.bf16.mxu1 %v4450_v25  ;;  %v4478_v21 = vld [vmem:[%s5872_s1 + $0x128] sm:$0xff]   ;;  %v439_v25 = vld [vmem:[%s4762_s26 + $0x100] sm:$0xff]  ;;  %v413_v39 = vld [vmem:[%s4762_s26 + $0x30] sm:$0xff] }
  0x1f   : > { %v4479_v22 = vld [vmem:[%s5872_s1 + $0x1e8] sm:$0xff]   ;;  %v433_v60 = vld [vmem:[%s4762_s26 + $0xd0] sm:$0xff]  ;;  %v434_v62 = vld [vmem:[%s4762_s26 + $0xd8] sm:$0xff] }
  0x20   : > { %4050 = vmatpush3.bf16.msra.mxu0 %v4451_v26  ;;  %v4480_v23 = vld [vmem:[%s5872_s1 + $0x1a8] sm:$0xff]   ;;  %v437_v61 = vld [vmem:[%s4762_s26 + $0xf0] sm:$0xff]  ;;  %v438_v63 = vld [vmem:[%s4762_s26 + $0xf8] sm:$0xff] }
  0x21   : > { %4096 = vmatpush3.bf16.msra.mxu1 %v4452_v27  ;;  %4051 = vmatprep.subr.bf16.mxu0 %v4453_v28  ;;  %v440_v26 = vld [vmem:[%s4762_s26 + $0x108] sm:$0xff]  ;;  %v3710_v27 = vcombine.high %v439_v25, %v439_v25  ;;  %v4497_v12 = vld [vmem:[%s5874_s3 + $0x40] sm:$0xff]  }
  0x22   : > { %4097 = vmatprep.subr.bf16.mxu1 %v4454_v29  ;;  %v3712_v28 = vcombine.high %v440_v26, %v440_v26  ;;  %v4484_v29 = vld [vmem:[%s5872_s1 + $0x130] sm:$0xff]   ;;  %v3711_v32 = vcombine.low %v440_v26, %v440_v26  ;;  %v4498_v13 = vld [vmem:[%s5874_s3] sm:$0xff]   ;;  %v4513_v26 = vld [vmem:[%s5874_s3 + $0xd8] sm:$0xff]  }
  0x23   : > { %v4503_v15 = vld [vmem:[%s5874_s3 + $0x80] sm:$0xff]  }
  0x24   : > { %4052 = vmatpush3.bf16.msra.mxu0 %v4455_v30  ;;  %v3709_v30 = vcombine.low %v439_v25, %v439_v25  ;;  %v4508_v25 = vld [vmem:[%s5874_s3 + $0x18] sm:$0xff]  }
  0x25   : > { %4098 = vmatpush3.bf16.msra.mxu1 %v4456_v31  ;;  %4129 = vmatprep.subr.bf16.mxu0 %v4457_v40  ;;  %v4487_v31 = vld [vmem:[%s5872_s1 + $0x1f0] sm:$0xff]   ;;  %v410_v40 = vld [vmem:[%s4762_s26 + $0x18] sm:$0xff] }
  0x26   : > { %4175 = vmatprep.subr.bf16.mxu1 %v4459_v42  ;;  %v414_v42 = vld [vmem:[%s4762_s26 + $0x38] sm:$0xff] }
  0x27   : > { %1183 = vmatmul.mubr.bf16.vlgmr.msra.gmra.mrb[0].mxu0 %v3677_v35  ;;  %v4490_v35 = vld [vmem:[%s5872_s1 + $0x138] sm:$0xff]   ;;  %v3684_v46 = vcombine.high %v410_v40, %v414_v42  ;;  %v3683_v49 = vcombine.low %v410_v40, %v414_v42 }
  0x28   : > { %1255 = vmatmul.mubr.bf16.vlgmr.msra.gmra.mrb[0].mxu1 %v3679_v38  ;;  %4130 = vmatpush3.bf16.msra.mxu0 %v4458_v41  ;;  %v409_v38 = vld [vmem:[%s4762_s26 + $0x10] sm:$0xff]  ;;  %v4525_v40 = vld [vmem:[%s5874_s3 + $0x78] sm:$0xff]  }
  0x29   : > { %4176 = vmatpush3.bf16.msra.mxu1 %v4460_v43  ;;  %4131 = vmatprep.subr.bf16.mxu0 %v4461_v44  ;;  %v3682_v41 = vcombine.high %v409_v38, %v413_v39  ;;  %v417_v43 = vld [vmem:[%s4762_s26 + $0x50] sm:$0xff]  ;;  %v4527_v42 = vld [vmem:[%s5874_s3 + $0xf8] sm:$0xff]  }
  0x2a   : > { %1190 = vmatprep.mubr.bf16.mxu0 %v3686_v48  ;;  %1262 = vmatprep.mubr.bf16.mxu1 %v3688_v52  ;;  %v421_v44 = vld [vmem:[%s4762_s26 + $0x70] sm:$0xff]  ;;  %v422_v48 = vld [vmem:[%s4762_s26 + $0x78] sm:$0xff] }
  0x2b   : > { %4177 = vmatprep.subr.bf16.mxu1 %v4463_v53  ;;  %v3690_v50 = vcombine.high %v417_v43, %v421_v44  ;;  %v425_v52 = vld [vmem:[%s4762_s26 + $0x90] sm:$0xff] }
  0x2c   : > { %4132 = vmatpush3.bf16.msra.mxu0 %v4462_v45  ;;  %v3681_v45 = vcombine.low %v409_v38, %v413_v39  ;;  %v429_v53 = vld [vmem:[%s4762_s26 + $0xb0] sm:$0xff] }
  0x2d   : > { %4178 = vmatpush3.bf16.msra.mxu1 %v4464_v55  ;;  %4133 = vmatprep.subr.bf16.mxu0 %v4465_v56  ;;  %v430_v55 = vld [vmem:[%s4762_s26 + $0xb8] sm:$0xff]  ;;  %v3689_v56 = vcombine.low %v417_v43, %v421_v44  ;;  %v4523_v38 = vld [vmem:[%s5874_s3 + $0xf0] sm:$0xff]   ;;  %v4532_v44 = vld [vmem:[%s5874_s3 + $0x140] sm:$0xff]  }
  0x2e   : > { %4179 = vmatprep.subr.bf16.mxu1 %v4467_v58  ;;  %v3698_v58 = vcombine.high %v425_v52, %v429_v53  ;;  %v4524_v39 = vld [vmem:[%s5874_s3 + $0xb0] sm:$0xff]   ;;  %v4528_v43 = vld [vmem:[%s5874_s3 + $0xb8] sm:$0xff]  }
  0x2f   : > { %1191 = vmatmul.mubr.bf16.gmra.mrb[4].mxu0 %v3685_v51  ;;  %v3692_v51 = vcombine.high %v418_v47, %v422_v48 }
  0x30   : > { %1263 = vmatmul.mubr.bf16.gmra.mrb[4].mxu1 %v3687_v54  ;;  %4134 = vmatpush3.bf16.msra.mxu0 %v4466_v57  ;;  %v426_v54 = vld [vmem:[%s4762_s26 + $0x98] sm:$0xff]  ;;  %v3691_v57 = vcombine.low %v418_v47, %v422_v48  ;;  %v5007_v48 = vld [vmem:[%s5873_s2] ss:$0 sm:$0xff] }
  0x31   : > { %4180 = vmatpush3.bf16.msra.mxu1 %v4468_v59  ;;  %1198 = vmatprep.mubr.bf16.mxu0 %v3694_v0  ;;  %v3700_v59 = vcombine.high %v426_v54, %v430_v55  ;;  %v3697_v0 = vcombine.low %v425_v52, %v429_v53 }
  0x32   : > { %1270 = vmatprep.mubr.bf16.mxu1 %v3696_v1  ;;  %4135 = vmatprep.subr.bf16.mxu0 %v4469_v2  ;;  %v3699_v1 = vcombine.low %v426_v54, %v430_v55  ;;  %v3706_v2 = vcombine.high %v433_v60, %v437_v61 }
  0x33   : > { %4181 = vmatprep.subr.bf16.mxu1 %v4471_v6  ;;  %v3705_v6 = vcombine.low %v433_v60, %v437_v61  ;;  %v280_v60 = vlaneseq }
  0x34   : > { %4136 = vmatpush3.bf16.msra.mxu0 %v4470_v5  ;;  %v442_v5 = vld [vmem:[%s4762_s26 + $0x118] sm:$0xff] }
  0x35   : > { %4182 = vmatpush3.bf16.msra.mxu1 %v4472_v7  ;;  %4137 = vmatprep.subr.bf16.mxu0 %v4473_v8  ;;  %v3707_v7 = vcombine.low %v434_v62, %v438_v63  ;;  %v3715_v11 = vcombine.low %v442_v5, %v442_v5 }
  0x36   : > { %4183 = vmatprep.subr.bf16.mxu1 %v4475_v10 }
  0x37   : > { %1199 = vmatmul.mubr.bf16.gmra.mrb[8].mxu0 %v3693_v3  ;;  %v3708_v3 = vcombine.high %v434_v62, %v438_v63 }
  0x38   : > { %1271 = vmatmul.mubr.bf16.gmra.mrb[8].mxu1 %v3695_v4  ;;  %4138 = vmatpush3.bf16.msra.mxu0 %v4474_v9  ;;  %v441_v4 = vld [vmem:[%s4762_s26 + $0x110] sm:$0xff]  ;;  %v3716_v9 = vcombine.high %v442_v5, %v442_v5 }
  0x39   : > { %1206 = vmatprep.mubr.bf16.mxu0 %v3702_v14  ;;  %1278 = vmatprep.mubr.bf16.mxu1 %v3704_v17  ;;  %v3714_v8 = vcombine.high %v441_v4, %v441_v4  ;;  %v3713_v10 = vcombine.low %v441_v4, %v441_v4  ;;  %v4501_v14 = vld [vmem:[%s5874_s3 + $0xc0] sm:$0xff]   ;;  %v4500_v17 = vld [vmem:[%s5874_s3 + $0x8] sm:$0xff]  }
  0x3a   : > { %4184 = vmatpush3.bf16.msra.mxu1 %v4476_v18  ;;  %4139 = vmatprep.subr.bf16.mxu0 %v4477_v20  ;;  %v4505_v18 = vld [vmem:[%s5874_s3 + $0xc8] sm:$0xff]   ;;  %v4502_v20 = vld [vmem:[%s5874_s3 + $0x50] sm:$0xff]  }
  0x3b   : > { %4185 = vmatprep.subr.bf16.mxu1 %v4479_v22  ;;  %v4509_v22 = vld [vmem:[%s5874_s3 + $0xd0] sm:$0xff]  }
  0x3c   : > { %4140 = vmatpush3.bf16.msra.mxu0 %v4478_v21  ;;  %v4504_v21 = vld [vmem:[%s5874_s3 + $0x10] sm:$0xff]  }
  0x3d   : > { %4141 = vmatprep.subr.bf16.mxu0 %v4481_v24  ;;  %v4507_v24 = vld [vmem:[%s5874_s3 + $0x58] sm:$0xff]  }
  0x3e   : > { %4186 = vmatpush3.bf16.msra.mxu1 %v4480_v23  ;;  %v4510_v23 = vld [vmem:[%s5874_s3 + $0x90] sm:$0xff]  }
  0x3f   : > { %1207 = vmatmul.mubr.bf16.gmra.mrb[12].mxu0 %v3701_v16  ;;  %4187 = vmatprep.subr.bf16.mxu1 %v4487_v31  ;;  %v4499_v16 = vld [vmem:[%s5874_s3 + $0x48] sm:$0xff]   ;;  %v4518_v31 = vld [vmem:[%s5874_s3 + $0xa0] sm:$0xff]  }
  0x40   : > { %1279 = vmatmul.mubr.bf16.gmra.mrb[12].mxu1 %v3703_v19  ;;  %1214 = vmatprep.mubr.bf16.mxu0 %v3710_v27  ;;  %v4506_v19 = vld [vmem:[%s5874_s3 + $0x88] sm:$0xff]   ;;  %v4514_v27 = vld [vmem:[%s5874_s3 + $0x98] sm:$0xff]  }
  0x41   : > { %1286 = vmatprep.mubr.bf16.mxu1 %v3712_v28  ;;  %4142 = vmatpush3.bf16.msra.mxu0 %v4484_v29  ;;  %v4511_v28 = vld [vmem:[%s5874_s3 + $0x60] sm:$0xff]  }
  0x42   : > { %4188 = vmatpush3.bf16.msra.mxu1 %v4488_v33  ;;  %4143 = vmatprep.subr.bf16.mxu0 %v4489_v34  ;;  %v4512_v29 = vld [vmem:[%s5874_s3 + $0x20] sm:$0xff]   ;;  %v4517_v33 = vld [vmem:[%s5874_s3 + $0x28] sm:$0xff]  }
  0x43   : > { %4189 = vmatprep.subr.bf16.mxu1 %v4491_v36  ;;  %v4519_v34 = vld [vmem:[%s5874_s3 + $0xe8] sm:$0xff]   ;;  %v4520_v36 = vld [vmem:[%s5874_s3 + $0x70] sm:$0xff]  }
  0x45   : > { %4144 = vmatpush3.bf16.msra.mxu0 %v4490_v35  ;;  %v4521_v35 = vld [vmem:[%s5874_s3 + $0xa8] sm:$0xff]  }
  0x46   : > { %4190 = vmatpush3.bf16.msra.mxu1 %v4492_v37  ;;  %4221 = vmatprep.subr.bf16.mxu0 %v4497_v12  ;;  %v4522_v37 = vld [vmem:[%s5874_s3 + $0x30] sm:$0xff]  }
  0x47   : > { %1215 = vmatmul.mubr.bf16.gmra.mrb[16].mxu0 %v3709_v30  ;;  %4255 = vmatprep.subr.bf16.mxu1 %v4501_v14  ;;  %v4516_v30 = vld [vmem:[%s5874_s3 + $0xe0] sm:$0xff]  }
  0x48   : > { %1287 = vmatmul.mubr.bf16.gmra.mrb[16].mxu1 %v3711_v32  ;;  %1326 = vmatprep.mubr.bf16.mxu0 %v3682_v41  ;;  %v4515_v32 = vld [vmem:[%s5874_s3 + $0x68] sm:$0xff]   ;;  %v4526_v41 = vld [vmem:[%s5874_s3 + $0x38] sm:$0xff]  }
  0x49   : > { %1398 = vmatprep.mubr.bf16.mxu1 %v3684_v46 }
  0x4f   : > { %1327 = vmatmul.mubr.bf16.vlgmr.msra.gmra.mrb[20].mxu0 %v3681_v45  ;;  %v4537_v45 = vld [vmem:[%s5874_s3 + $0x1c0] sm:$0xff]  }
  0x50   : > { %1399 = vmatmul.mubr.bf16.vlgmr.msra.gmra.mrb[20].mxu1 %v3683_v49  ;;  %1334 = vmatprep.mubr.bf16.mxu0 %v3690_v50 }
  0x51   : > { %1406 = vmatprep.mubr.bf16.mxu1 %v3692_v51  ;;  %4222 = vmatpush3.bf16.msra.mxu0 %v4498_v13 }
  0x52   : > { %4256 = vmatpush3.bf16.msra.mxu1 %v4503_v15  ;;  %4223 = vmatprep.subr.bf16.mxu0 %v4499_v16 }
  0x53   : > { %4257 = vmatprep.subr.bf16.mxu1 %v4505_v18 }
  0x55   : > { %4224 = vmatpush3.bf16.msra.mxu0 %v4500_v17 }
  0x56   : > { %4258 = vmatpush3.bf16.msra.mxu1 %v4506_v19  ;;  %4225 = vmatprep.subr.bf16.mxu0 %v4502_v20 }
  0x57   : > { %1335 = vmatmul.mubr.bf16.gmra.mrb[24].mxu0 %v3689_v56  ;;  %4259 = vmatprep.subr.bf16.mxu1 %v4509_v22 }
  0x58   : > { %1407 = vmatmul.mubr.bf16.gmra.mrb[24].mxu1 %v3691_v57  ;;  %1342 = vmatprep.mubr.bf16.mxu0 %v3698_v58 }
  0x59   : > { %1414 = vmatprep.mubr.bf16.mxu1 %v3700_v59  ;;  %4226 = vmatpush3.bf16.msra.mxu0 %v4504_v21 }
  0x5a   : > { %4260 = vmatpush3.bf16.msra.mxu1 %v4510_v23  ;;  %4227 = vmatprep.subr.bf16.mxu0 %v4507_v24 }
  0x5b   : > { %4261 = vmatprep.subr.bf16.mxu1 %v4513_v26 }
  0x5d   : > { %4228 = vmatpush3.bf16.msra.mxu0 %v4508_v25 }
  0x5e   : > { %4262 = vmatpush3.bf16.msra.mxu1 %v4514_v27  ;;  %4229 = vmatprep.subr.bf16.mxu0 %v4511_v28 }
  0x5f   : > { %1343 = vmatmul.mubr.bf16.gmra.mrb[28].mxu0 %v3697_v0  ;;  %4263 = vmatprep.subr.bf16.mxu1 %v4516_v30 }
  0x60   : > { %1415 = vmatmul.mubr.bf16.gmra.mrb[28].mxu1 %v3699_v1  ;;  %1350 = vmatprep.mubr.bf16.mxu0 %v3706_v2 }
  0x61   : > { %1422 = vmatprep.mubr.bf16.mxu1 %v3708_v3  ;;  %4230 = vmatpush3.bf16.msra.mxu0 %v4512_v29  ;;  %v5015_v3 = vshrl.u32 %v280_v60, 7 }
  0x62   : > { %4264 = vmatpush3.bf16.msra.mxu1 %v4518_v31  ;;  %4231 = vmatprep.subr.bf16.mxu0 %v4515_v32 }
  0x63   : > { %4265 = vmatprep.subr.bf16.mxu1 %v4519_v34  ;;  %v282_v14 = vadd.s32 8, %v5015_v3  ;;  %v290_v17 = vcvt.s32.f32 %v5015_v3  ;;  %v283_v26 = vadd.s32 16, %v5015_v3 }
  0x65   : > { %4232 = vmatpush3.bf16.msra.mxu0 %v4517_v33  ;;  %v291_v22 = vcvt.s32.f32 %v282_v14  ;;  %v299_v30 = vadd.f32 4.0, %v290_v17 }
  0x66   : > { %4266 = vmatpush3.bf16.msra.mxu1 %v4521_v35  ;;  %4233 = vmatprep.subr.bf16.mxu0 %v4520_v36  ;;  %v284_v36 = vadd.s32 24, %v5015_v3 }
  0x67   : > { %1351 = vmatmul.mubr.bf16.gmra.mrb[32].mxu0 %v3705_v6  ;;  %4267 = vmatprep.subr.bf16.mxu1 %v4523_v38  ;;  %v300_v35 = vadd.f32 4.0, %v291_v22 }
  0x68   : > { %1423 = vmatmul.mubr.bf16.gmra.mrb[32].mxu1 %v3707_v7  ;;  %1358 = vmatprep.mubr.bf16.mxu0 %v3714_v8 }
  0x69   : > { %1430 = vmatprep.mubr.bf16.mxu1 %v3716_v9  ;;  %4234 = vmatpush3.bf16.msra.mxu0 %v4522_v37 }
  0x6a   : > { %4268 = vmatpush3.bf16.msra.mxu1 %v4524_v39  ;;  %4235 = vmatprep.subr.bf16.mxu0 %v4525_v40  ;;  %v292_v39 = vcvt.s32.f32 %v283_v26  ;;  %v308_v40 = vmul.f32 0.1, %v299_v30 }
  0x6b   : > { %4269 = vmatprep.subr.bf16.mxu1 %v4527_v42 }
  0x6d   : > { %4236 = vmatpush3.bf16.msra.mxu0 %v4526_v41 }
  0x6e   : > { %4270 = vmatpush3.bf16.msra.mxu1 %v4528_v43  ;;  %4289 = vmatprep.subr.bf16.mxu0 %v4532_v44 }
  0x6f   : > { %1359 = vmatmul.mubr.bf16.gmra.mrb[36].mxu0 %v3713_v10  ;;  %4323 = vmatprep.subr.bf16.mxu1 %v4537_v45  ;;  %v309_v45 = vmul.f32 0.1, %v300_v35 }
  0x70   : > { %1431 = vmatmul.mubr.bf16.gmra.mrb[36].mxu1 %v3715_v11 }
  0xfa   : > { %v4053_v46 = vpop.f32.mrb[0].mxu0 }
  0xfb   : > { %v4099_v47 = vpop.f32.mrb[0].mxu1  ;;  %v4054_v49 = vpop.f32.mrb[1].mxu0 }
  0xfc   : > { %v4055_v50 = vadd.f32 %v4054_v49, %v4053_v46  ;;  %v4100_v51 = vpop.f32.mrb[1].mxu1  ;;  %v4056_v52 = vpop.f32.mrb[2].mxu0  ;;  %v293_v46 = vcvt.s32.f32 %v284_v36 }
  0xfd   : > { %v4101_v53 = vadd.f32 %v4100_v51, %v4099_v47  ;;  %v4102_v54 = vpop.f32.mrb[2].mxu1  ;;  %v4057_v55 = vpop.f32.mrb[3].mxu0  ;;  %v285_v47 = vadd.s32 32, %v5015_v3 }
  0xfe   : > { %v1185_v56 = vadd.f32 %v4055_v50, %v5007_v48  ;;  %v4058_v57 = vadd.f32 %v4057_v55, %v4056_v52  ;;  %v4103_v58 = vpop.f32.mrb[3].mxu1  ;;  %v5034_v52 = vadd.f32 4.0, %v292_v39 }
  0xff   : > { %v4104_v59 = vadd.f32 %v4103_v58, %v4102_v54 }
 0x100   : > { %v5010_v61 = vadd.f32 %v4101_v53, %v1185_v56  ;;  %v1188_v62 = vadd.f32 %v4058_v57, %v5007_v48  ;;  %v317_v56 = vfloor.f32 %v308_v40  ;;  %v286_v57 = vadd.s32 40, %v5015_v3 }
 0x102   : > { %v5013_v63 = vadd.f32 %v4104_v59, %v1188_v62  ;;  %v4059_v0 = vpop.f32.mrb[4].mxu0  ;;  %vm344_vm0 = vcmp.ge.f32.partialorder %v317_v56, 2.0  ;;  %vm353_vm1 = vcmp.le.f32.partialorder %v317_v56, 5.0 }
 0x103   : > { %v4105_v1 = vpop.f32.mrb[4].mxu1  ;;  %v4060_v2 = vpop.f32.mrb[5].mxu0  ;;  %vm362_vm2 = vmand %vm344_vm0, %vm353_vm1 }
 0x104   : > { %v4061_v4 = vadd.f32 %v4060_v2, %v4059_v0  ;;  %v4106_v5 = vpop.f32.mrb[5].mxu1  ;;  %v4062_v6 = vpop.f32.mrb[6].mxu0  ;;  %v318_v0 = vfloor.f32 %v309_v45  ;;  %v294_v2 = vcvt.s32.f32 %v285_v47 }
 0x105   : > { %v4107_v7 = vadd.f32 %v4106_v5, %v4105_v1  ;;  %v4108_v8 = vpop.f32.mrb[6].mxu1  ;;  %v4063_v9 = vpop.f32.mrb[7].mxu0  ;;  %v5038_v1 = vadd.f32 4.0, %v293_v46 }
 0x106   : > { %v1193_v10 = vadd.f32 %v4061_v4, %v5007_v48  ;;  %v4064_v11 = vadd.f32 %v4063_v9, %v4062_v6  ;;  %v4109_v12 = vpop.f32.mrb[7].mxu1  ;;  %v310_v6 = vmul.f32 0.1, %v5034_v52  ;;  %v295_v9 = vcvt.s32.f32 %v286_v57 }
 0x107   : > { %v4110_v13 = vadd.f32 %v4109_v12, %v4108_v8  ;;  %v326_v8 = vmul.f32 10.0, %v317_v56  ;;  %v311_v14 = vmul.f32 0.1, %v5038_v1  ;;  %vm345_vm4 = vcmp.ge.f32.partialorder %v318_v0, 2.0 }
 0x108   : > { %v5019_v15 = vadd.f32 %v4107_v7, %v1193_v10  ;;  %v1196_v16 = vadd.f32 %v4064_v11, %v5007_v48  ;;  %v287_v7 = vadd.s32 48, %v5015_v3  ;;  %v319_v22 = vfloor.f32 %v310_v6 }
 0x109   : > { %vm354_vm5 = vcmp.le.f32.partialorder %v318_v0, 5.0 }
 0x10a   : > { %v5023_v18 = vadd.f32 %v4110_v13, %v1196_v16  ;;  %v4065_v19 = vpop.f32.mrb[8].mxu0  ;;  %v5048_v16 = vadd.f32 4.0, %v294_v2  ;;  %v328_v40 = vmul.f32 10.0, %v319_v22  ;;  %vm5074_vm9 = vmand %vm345_vm4, %vm354_vm5  ;;  %vm346_vm10 = vcmp.ge.f32.partialorder %v319_v22, 2.0 }
 0x10b   : > { %v4111_v20 = vpop.f32.mrb[8].mxu1  ;;  %v4066_v21 = vpop.f32.mrb[9].mxu0  ;;  %vm355_vm11 = vcmp.le.f32.partialorder %v319_v22, 5.0 }
 0x10c   : > { %v4067_v23 = vadd.f32 %v4066_v21, %v4065_v19  ;;  %v4112_v24 = vpop.f32.mrb[9].mxu1  ;;  %v4068_v25 = vpop.f32.mrb[10].mxu0  ;;  %v327_v21 = vmul.f32 10.0, %v318_v0  ;;  %v312_v36 = vmul.f32 0.1, %v5048_v16  ;;  %vm5103_vm15 = vmand %vm346_vm10, %vm355_vm11 }
 0x10d   : > { %v4113_v27 = vadd.f32 %v4112_v24, %v4111_v20  ;;  %v4114_v28 = vpop.f32.mrb[10].mxu1  ;;  %v4069_v29 = vpop.f32.mrb[11].mxu0 }
 0x10e   : > { %v1201_v31 = vadd.f32 %v4067_v23, %v5007_v48  ;;  %v4070_v32 = vadd.f32 %v4069_v29, %v4068_v25  ;;  %v4115_v33 = vpop.f32.mrb[11].mxu1  ;;  %v296_v23 = vcvt.s32.f32 %v287_v7  ;;  %v288_v29 = vadd.s32 56, %v5015_v3 }
 0x10f   : > { %v4116_v34 = vadd.f32 %v4115_v33, %v4114_v28  ;;  %v5050_v28 = vadd.f32 4.0, %v295_v9  ;;  %v289_v33 = vadd.s32 64, %v5015_v3  ;;  %v336_v39 = vsub.f32 %v300_v35, %v327_v21 }
 0x110   : > { %v5028_v37 = vadd.f32 %v4113_v27, %v1201_v31  ;;  %v1204_v38 = vadd.f32 %v4070_v32, %v5007_v48  ;;  %v335_v27 = vsub.f32 %v299_v30, %v326_v8  ;;  %v5060_v30 = vadd.f32 4.0, %v296_v23 }
 0x111   : > { %vm372_vm8 = vcmp.ge.f32.partialorder %v336_v39, 1.0  ;;  %vm390_vm14 = vcmp.le.f32.partialorder %v336_v39, 8.0 }
 0x112   : > { %v5031_v41 = vadd.f32 %v4116_v34, %v1204_v38  ;;  %v4071_v42 = vpop.f32.mrb[12].mxu0  ;;  %v5055_v34 = vfloor.f32 %v311_v14  ;;  %vm371_vm3 = vcmp.ge.f32.partialorder %v335_v27, 1.0  ;;  %vm389_vm6 = vcmp.le.f32.partialorder %v335_v27, 8.0  ;;  %vm381_vm13 = vmand %vm5074_vm9, %vm372_vm8 }
 0x113   : > { %v4117_v43 = vpop.f32.mrb[12].mxu1  ;;  %v4072_v44 = vpop.f32.mrb[13].mxu0  ;;  %vm5066_vm7 = vmand %vm362_vm2, %vm371_vm3 }
 0x114   : > { %v4073_v49 = vadd.f32 %v4072_v44, %v4071_v42  ;;  %v4118_v50 = vpop.f32.mrb[13].mxu1  ;;  %v4074_v51 = vpop.f32.mrb[14].mxu0  ;;  %v313_v42 = vmul.f32 0.1, %v5050_v28  ;;  %v298_v44 = vcvt.s32.f32 %v289_v33  ;;  %v329_v47 = vmul.f32 10.0, %v5055_v34  ;;  %vm5088_vm12 = vmand %vm5066_vm7, %vm389_vm6 }
 0x115   : > { %v4119_v53 = vadd.f32 %v4118_v50, %v4117_v43  ;;  %v4120_v54 = vpop.f32.mrb[14].mxu1  ;;  %v4075_v55 = vpop.f32.mrb[15].mxu0  ;;  %vm347_vm1 = vcmp.ge.f32.partialorder %v5055_v34, 2.0  ;;  %vm356_vm2 = vcmp.le.f32.partialorder %v5055_v34, 5.0  ;;  %vm5112_vm3 = vmand %vm381_vm13, %vm390_vm14 }
 0x116   : > { %v1209_v58 = vadd.f32 %v4073_v49, %v5007_v48  ;;  %v4076_v59 = vadd.f32 %v4075_v55, %v4074_v51  ;;  %v4121_v60 = vpop.f32.mrb[15].mxu1  ;;  %v5064_v49 = vfloor.f32 %v312_v36  ;;  %v314_v55 = vmul.f32 0.1, %v5060_v30  ;;  %vm5135_vm8 = vmand %vm347_vm1, %vm356_vm2 }
 0x117   : > { %v4122_v62 = vadd.f32 %v4121_v60, %v4120_v54  ;;  %v337_v54 = vsub.f32 %v5034_v52, %v328_v40  ;;  %v5078_v60 = vfloor.f32 %v313_v42  ;;  %v5083_v6 = vadd.f32 4.0, %v298_v44 }
 0x118   : > { %v5040_v4 = vadd.f32 %v4119_v53, %v1209_v58  ;;  %v1212_v5 = vadd.f32 %v4076_v59, %v5007_v48  ;;  %v5093_v8 = vsub.f32 %v5038_v1, %v329_v47  ;;  %v330_v9 = vmul.f32 10.0, %v5064_v49 }
 0x119   : > { %vm373_vm0 = vcmp.ge.f32.partialorder %v337_v54, 1.0  ;;  %v331_v1 = vmul.f32 10.0, %v5078_v60  ;;  %vm391_vm4 = vcmp.le.f32.partialorder %v337_v54, 8.0  ;;  %vm348_vm6 = vcmp.ge.f32.partialorder %v5064_v49, 2.0 }
 0x11a   : > { %v5045_v10 = vadd.f32 %v4122_v62, %v1212_v5  ;;  %v4077_v11 = vpop.f32.mrb[16].mxu0  ;;  %vm374_vm5 = vcmp.ge.f32.partialorder %v5093_v8, 1.0  ;;  %vm5126_vm7 = vmand %vm5103_vm15, %vm373_vm0  ;;  %vm357_vm9 = vcmp.le.f32.partialorder %v5064_v49, 5.0  ;;  %vm349_vm11 = vcmp.ge.f32.partialorder %v5078_v60, 2.0 }
 0x11b   : > { %v4123_v12 = vpop.f32.mrb[16].mxu1  ;;  %v4078_v13 = vpop.f32.mrb[17].mxu0  ;;  %v5141_v42 = vsub.f32 %v5050_v28, %v331_v1  ;;  %vm5153_vm10 = vmand %vm5126_vm7, %vm391_vm4  ;;  %vm392_vm14 = vcmp.le.f32.partialorder %v5093_v8, 8.0 }
 0x11c   : > { %v4079_v17 = vadd.f32 %v4078_v13, %v4077_v11  ;;  %v4124_v19 = vpop.f32.mrb[17].mxu1  ;;  %v4080_v20 = vpop.f32.mrb[18].mxu0  ;;  %vm383_vm13 = vmand %vm5135_vm8, %vm374_vm5 }
 0x11d   : > { %v4125_v24 = vadd.f32 %v4124_v19, %v4123_v12  ;;  %v4126_v25 = vpop.f32.mrb[18].mxu1  ;;  %v4081_v26 = vpop.f32.mrb[19].mxu0  ;;  %v5100_v12 = vfloor.f32 %v314_v55  ;;  %v316_v20 = vmul.f32 0.1, %v5083_v6  ;;  %vm5172_vm15 = vmand %vm348_vm6, %vm357_vm9  ;;  %vm376_vm2 = vcmp.ge.f32.partialorder %v5141_v42, 1.0 }
 0x11e   : > { %v1217_v31 = vadd.f32 %v4079_v17, %v5007_v48  ;;  %v4127_v32 = vpop.f32.mrb[19].mxu1  ;;  %v297_v48 = vcvt.s32.f32 %v288_v29  ;;  %vm394_vm5 = vcmp.le.f32.partialorder %v5141_v42, 8.0 }
 0x11f   : > { %v332_v33 = vmul.f32 10.0, %v5100_v12  ;;  %v5148_v47 = vfloor.f32 %v316_v20  ;;  %vm350_vm6 = vcmp.ge.f32.partialorder %v5100_v12, 2.0  ;;  %vm359_vm7 = vcmp.le.f32.partialorder %v5100_v12, 5.0 }
 0x120   : > { %v5058_v38 = vadd.f32 %v4125_v24, %v1217_v31  ;;  %v5080_v62 = vadd.f32 4.0, %v297_v48  ;;  %v5118_v24 = vsub.f32 %v5048_v16, %v330_v9 }
 0x121   : > { %v5166_v50 = vsub.f32 %v5060_v30, %v332_v33  ;;  %v334_v30 = vmul.f32 10.0, %v5148_v47 }
 0x122   : > { %v4145_v43 = vpop.f32.mrb[20].mxu0  ;;  %v315_v14 = vmul.f32 0.1, %v5080_v62  ;;  %vm375_vm0 = vcmp.ge.f32.partialorder %v5118_v24, 1.0  ;;  %vm393_vm4 = vcmp.le.f32.partialorder %v5118_v24, 8.0 }
 0x123   : > { %v4191_v45 = vpop.f32.mrb[20].mxu1  ;;  %v4146_v46 = vpop.f32.mrb[21].mxu0  ;;  %vm5198_vm8 = vmand %vm5172_vm15, %vm375_vm0  ;;  %vm377_vm9 = vcmp.ge.f32.partialorder %v5166_v50, 1.0  ;;  %vm395_vm0 = vcmp.le.f32.partialorder %v5166_v50, 8.0 }
 0x124   : > { %v4147_v35 = vadd.f32 %v4146_v46, %v4145_v43  ;;  %v4192_v51 = vpop.f32.mrb[21].mxu1  ;;  %v4148_v53 = vpop.f32.mrb[22].mxu0  ;;  %v5143_v48 = vfloor.f32 %v315_v14 }
 0x125   : > { %v4193_v56 = vadd.f32 %v4192_v51, %v4191_v45  ;;  %v4194_v57 = vpop.f32.mrb[22].mxu1  ;;  %v4149_v58 = vpop.f32.mrb[23].mxu0 }
 0x126   : > { %v1329_v2 = vadd.f32 %v4147_v35, %v5010_v61  ;;  %v4150_v5 = vadd.f32 %v4149_v58, %v4148_v53  ;;  %v4195_v52 = vpop.f32.mrb[23].mxu1 }
 0x127   : > { %v4196_v7 = vadd.f32 %v4195_v52, %v4194_v57 }
 0x128   : > { %v1401_v11 = vadd.f32 %v4193_v56, %v1329_v2  ;;  %v1332_v61 = vadd.f32 %v4150_v5, %v5013_v63 }
 0x12a   : > { %v1438_v63 = vmax.f32 %v1401_v11, 0.0  ;;  %v1404_v17 = vadd.f32 %v4196_v7, %v1332_v61  ;;  %v4151_v19 = vpop.f32.mrb[24].mxu0  ;;  %v4545_v11 = vld [vmem:[%s5874_s3 + $0x150] sm:$0xff]  }
 0x12b   : > { %v4197_v22 = vpop.f32.mrb[24].mxu1  ;;  %v4152_v23 = vpop.f32.mrb[25].mxu0 }
 0x12c   : > { %v1447_v25 = vsel %vm5088_vm12, %v1438_v63, 0.0  ;;  %v1439_v26 = vmax.f32 %v1404_v17, 0.0  ;;  %v4153_v27 = vadd.f32 %v4152_v23, %v4151_v19  ;;  %v4198_v31 = vpop.f32.mrb[25].mxu1  ;;  %v4154_v32 = vpop.f32.mrb[26].mxu0  ;;  %vm358_vm12 = vcmp.le.f32.partialorder %v5078_v60, 5.0 }
 0x12d   : > { %1456 = vst [vmem:[#allocation2] sm:$0xff] %v1447_v25  ;;  %v4199_v16 = vadd.f32 %v4198_v31, %v4197_v22  ;;  %v4200_v36 = vpop.f32.mrb[26].mxu1  ;;  %v4155_v39 = vpop.f32.mrb[27].mxu0  ;;  %vm5178_vm1 = vmand %vm349_vm11, %vm358_vm12  ;;  %vm351_vm11 = vcmp.ge.f32.partialorder %v5143_v48, 2.0  ;;  %v5219_v22 = vsub.f32 %v5083_v6, %v334_v30 }
 0x12e   : > { %v1448_v43 = vsel %vm5112_vm3, %v1439_v26, 0.0  ;;  %v1337_v44 = vadd.f32 %v4153_v27, %v5019_v15  ;;  %v4156_v45 = vadd.f32 %v4155_v39, %v4154_v32  ;;  %v4201_v46 = vpop.f32.mrb[27].mxu1  ;;  %vm5184_vm3 = vmand %vm383_vm13, %vm392_vm14  ;;  %vm360_vm14 = vcmp.le.f32.partialorder %v5143_v48, 5.0 }
 0x12f   : > { %1457 = vst [vmem:[#allocation2 + $0x8] sm:$0xff] %v1448_v43  ;;  %v4202_v28 = vadd.f32 %v4201_v46, %v4200_v36  ;;  %vm5225_vm12 = vmand %vm350_vm6, %vm359_vm7  ;;  %vm379_vm7 = vcmp.ge.f32.partialorder %v5219_v22, 1.0 }
 0x130   : > { %v1409_v35 = vadd.f32 %v4199_v16, %v1337_v44  ;;  %v1340_v15 = vadd.f32 %v4156_v45, %v5023_v18  ;;  %v333_v18 = vmul.f32 10.0, %v5143_v48  ;;  %vm5234_vm13 = vmand %vm5198_vm8, %vm393_vm4  ;;  %vm397_vm8 = vcmp.le.f32.partialorder %v5219_v22, 8.0 }
 0x131   : > { %vm5262_vm4 = vmand %vm351_vm11, %vm360_vm14 }
 0x132   : > { %v1440_v53 = vmax.f32 %v1409_v35, 0.0  ;;  %v1412_v54 = vadd.f32 %v4202_v28, %v1340_v15  ;;  %v4157_v55 = vpop.f32.mrb[28].mxu0  ;;  %v5212_v61 = vsub.f32 %v5080_v62, %v333_v18  ;;  %v4539_v35 = vld [vmem:[%s5874_s3 + $0x148] sm:$0xff]  }
 0x133   : > { %v4158_v57 = vpop.f32.mrb[29].mxu0  ;;  %v4203_v58 = vpop.f32.mrb[28].mxu1 }
 0x134   : > { %v1449_v59 = vsel %vm5153_vm10, %v1440_v53, 0.0  ;;  %v1441_v60 = vmax.f32 %v1412_v54, 0.0  ;;  %v4159_v2 = vadd.f32 %v4158_v57, %v4157_v55  ;;  %v4160_v5 = vpop.f32.mrb[30].mxu0  ;;  %v4204_v0 = vpop.f32.mrb[29].mxu1  ;;  %vm5207_vm10 = vmand %vm5178_vm1, %vm376_vm2  ;;  %vm352_vm2 = vcmp.ge.f32.partialorder %v5148_v47, 2.0 }
 0x135   : > { %1458 = vst [vmem:[#allocation2 + $0x10] sm:$0xff] %v1449_v59  ;;  %v4161_v7 = vpop.f32.mrb[31].mxu0  ;;  %v4205_v8 = vadd.f32 %v4204_v0, %v4203_v58  ;;  %v4206_v9 = vpop.f32.mrb[30].mxu1  ;;  %v4012_v13 = vpack.c.bf16 %v1449_v59, %v1449_v59  ;;  %vm5243_vm15 = vmand %vm5207_vm10, %vm394_vm5  ;;  %vm378_vm5 = vcmp.ge.f32.partialorder %v5212_v61, 1.0  ;;  %vm396_vm6 = vcmp.le.f32.partialorder %v5212_v61, 8.0 }
 0x136   : > { %v1465_v1 = vld [vmem:[#allocation2 + $0x5] sm:$0xff]  ;;  %v1450_v17 = vsel %vm5184_vm3, %v1441_v60, 0.0  ;;  %v1345_v19 = vadd.f32 %v4159_v2, %v5028_v37  ;;  %v4162_v20 = vadd.f32 %v4161_v7, %v4160_v5  ;;  %v4207_v21 = vpop.f32.mrb[31].mxu1  ;;  %vm5252_vm1 = vmand %vm5225_vm12, %vm377_vm9  ;;  %vm361_vm3 = vcmp.le.f32.partialorder %v5148_v47, 5.0 }
 0x137   : > { %v1496_v14 = vld [vmem:[#allocation2 + $0x6] sm:$0xff]  ;;  %1459 = vst [vmem:[#allocation2 + $0x18] sm:$0xff] %v1450_v17  ;;  %v4208_v23 = vadd.f32 %v4207_v21, %v4206_v9  ;;  %v3992_v25 = vpack.c.bf16 %v1465_v1, %v1465_v1  ;;  %1615 = vst [vmem:[#allocation3 + $0x10] sm:$0xf] %v4012_v13  ;;  %v4013_v12 = vpack.c.bf16 %v1450_v17, %v1450_v17 }
 0x138   : > { %v1527_v63 = vld [vmem:[#allocation2 + $0x7] sm:$0xff]  ;;  %v3997_v26 = vpack.c.bf16 %v1496_v14, %v1496_v14  ;;  %v1348_v37 = vadd.f32 %v4162_v20, %v5031_v41  ;;  %v1417_v29 = vadd.f32 %v4205_v8, %v1345_v19  ;;  %vm5276_vm9 = vmand %vm352_vm2, %vm361_vm3 }
 0x139   : > { %v4002_v27 = vpack.c.bf16 %v1527_v63, %v1527_v63  ;;  %1491 = vst [vmem:[#allocation3] sm:$0xf] %v3992_v25  ;;  %1616 = vst [vmem:[#allocation3 + $0x34] sm:$0xf] %v4013_v12 }
 0x13a   : > { %1522 = vst [vmem:[#allocation3 + $0x4] sm:$0xf] %v3997_v26  ;;  %v1442_v41 = vmax.f32 %v1417_v29, 0.0  ;;  %v1420_v24 = vadd.f32 %v4208_v23, %v1348_v37  ;;  %v4163_v32 = vpop.f32.mrb[32].mxu0  ;;  %vm5287_vm10 = vmand %vm5262_vm4, %vm378_vm5 }
 0x13b   : > { %1553 = vst [vmem:[#allocation3 + $0x8] sm:$0xf] %v4002_v27  ;;  %v4164_v16 = vpop.f32.mrb[33].mxu0  ;;  %v4209_v36 = vpop.f32.mrb[32].mxu1  ;;  %vm5296_vm11 = vmand %vm5276_vm9, %vm379_vm7 }
 0x13c   : > { %v1466_v40 = vld [vmem:[#allocation2 + $0xd] sm:$0xff]  ;;  %v1451_v44 = vsel %vm5234_vm13, %v1442_v41, 0.0  ;;  %v1443_v45 = vmax.f32 %v1420_v24, 0.0  ;;  %v4165_v48 = vadd.f32 %v4164_v16, %v4163_v32  ;;  %v4166_v46 = vpop.f32.mrb[34].mxu0  ;;  %v4210_v28 = vpop.f32.mrb[33].mxu1  ;;  %vm5304_vm12 = vmand %vm5252_vm1, %vm395_vm0 }
 0x13d   : > { %v1497_v42 = vld [vmem:[#allocation2 + $0xe] sm:$0xff]  ;;  %1460 = vst [vmem:[#allocation2 + $0x20] sm:$0xff] %v1451_v44  ;;  %v4167_v34 = vpop.f32.mrb[35].mxu0  ;;  %v3993_v15 = vpack.c.bf16 %v1466_v40, %v1466_v40  ;;  %v4014_v53 = vpack.c.bf16 %v1451_v44, %v1451_v44  ;;  %v4211_v58 = vadd.f32 %v4210_v28, %v4209_v36  ;;  %v4212_v59 = vpop.f32.mrb[34].mxu1  ;;  %vm5312_vm13 = vmand %vm5287_vm10, %vm396_vm6 }
 0x13e   : > { %v1528_v43 = vld [vmem:[#allocation2 + $0xf] sm:$0xff]  ;;  %v3998_v51 = vpack.c.bf16 %v1497_v42, %v1497_v42  ;;  %v1529_v56 = vld [vmem:[#allocation2 + $0x17] sm:$0xff]  ;;  %v1452_v30 = vsel %vm5243_vm15, %v1443_v45, 0.0  ;;  %v1353_v49 = vadd.f32 %v4165_v48, %v5040_v4  ;;  %v4168_v57 = vadd.f32 %v4167_v34, %v4166_v46  ;;  %v4213_v2 = vpop.f32.mrb[35].mxu1  ;;  %vm5320_vm14 = vmand %vm5296_vm11, %vm397_vm8 }
 0x13f   : > { %v4003_v18 = vpack.c.bf16 %v1528_v43, %v1528_v43  ;;  %v1467_v54 = vld [vmem:[#allocation2 + $0x15] sm:$0xff]  ;;  %1461 = vst [vmem:[#allocation2 + $0x28] sm:$0xff] %v1452_v30  ;;  %1492 = vst [vmem:[#allocation3 + $0x24] sm:$0xf] %v3993_v15  ;;  %v4008_v5 = vpack.c.bf16 %v1529_v56, %v1529_v56  ;;  %v4015_v0 = vpack.c.bf16 %v1452_v30, %v1452_v30  ;;  %v4533_v43 = vld [vmem:[%s5874_s3 + $0x100] sm:$0xff]   ;;  %vm4612_vm15 = vmmov 0  }
 0x140   : > { %v1498_v55 = vld [vmem:[#allocation2 + $0x16] sm:$0xff]  ;;  %1523 = vst [vmem:[#allocation3 + $0x28] sm:$0xf] %v3998_v51  ;;  %v3994_v4 = vpack.c.bf16 %v1467_v54, %v1467_v54  ;;  %1617 = vst [vmem:[#allocation3 + $0x58] sm:$0xf] %v4014_v53  ;;  %v1356_v7 = vadd.f32 %v4168_v57, %v5045_v10  ;;  %v1425_v8 = vadd.f32 %v4211_v58, %v1353_v49  ;;  %v4538_v30 = vld [vmem:[%s5874_s3 + $0x180] sm:$0xff]  }
 0x141   : > { %v1620_v47 = vld [vmem:[#allocation2 + $0x11] sm:$0xff]  ;;  %1554 = vst [vmem:[#allocation3 + $0x2c] sm:$0xf] %v4003_v18  ;;  %1584 = vst [vmem:[#allocation3 + $0xc] sm:$0xf] %v4003_v18  ;;  %v3999_v52 = vpack.c.bf16 %v1498_v55, %v1498_v55  ;;  %v4214_v9 = vadd.f32 %v4213_v2, %v4212_v59  ;;  %v4540_v2 = vld [vmem:[%s5874_s3 + $0x108] sm:$0xff]  }
 0x142   : > { %v4017_v13 = vpack.c.bf16 %v1620_v47, %v1620_v47  ;;  %1585 = vst [vmem:[#allocation3 + $0x30] sm:$0xf] %v4008_v5  ;;  %1493 = vst [vmem:[#allocation3 + $0x48] sm:$0xf] %v3994_v4  ;;  %v1444_v10 = vmax.f32 %v1425_v8, 0.0  ;;  %v4169_v63 = vpop.f32.mrb[36].mxu0 }
 0x143   : > { %1524 = vst [vmem:[#allocation3 + $0x4c] sm:$0xf] %v3999_v52  ;;  %1555 = vst [vmem:[#allocation3 + $0x50] sm:$0xf] %v4008_v5  ;;  %v1428_v50 = vadd.f32 %v4214_v9, %v1356_v7  ;;  %v4170_v17 = vpop.f32.mrb[37].mxu0  ;;  %v4215_v19 = vpop.f32.mrb[36].mxu1 }
 0x144   : > { %1618 = vst [vmem:[#allocation3 + $0x7c] sm:$0xf] %v4015_v0  ;;  %1646 = vst [vmem:[#allocation3 + $0x14] sm:$0xf] %v4017_v13  ;;  %v1468_v61 = vld [vmem:[#allocation2 + $0x1d] sm:$0xff]  ;;  %v5326_v62 = vsel %vm5304_vm12, %v1444_v10, 0.0  ;;  %v4171_v26 = vadd.f32 %v4170_v17, %v4169_v63 }
 0x145   : > { %v1499_v21 = vld [vmem:[#allocation2 + $0x1e] sm:$0xff]  ;;  %v1445_v25 = vmax.f32 %v1428_v50, 0.0  ;;  %v4216_v27 = vpop.f32.mrb[37].mxu1  ;;  %1462 = vst [vmem:[#allocation2 + $0x30] sm:$0xff] %v5326_v62  ;;  %v3995_v12 = vpack.c.bf16 %v1468_v61, %v1468_v61  ;;  %v4172_v24 = vpop.f32.mrb[38].mxu0  ;;  %v4016_v59 = vpack.c.bf16 %v5326_v62, %v5326_v62  ;;  %v4541_v5 = vld [vmem:[%s5874_s3 + $0x1c8] sm:$0xff]  }
 0x146   : > { %v1530_v23 = vld [vmem:[#allocation2 + $0x1f] sm:$0xff]  ;;  %v4217_v22 = vadd.f32 %v4216_v27, %v4215_v19  ;;  %v4000_v31 = vpack.c.bf16 %v1499_v21, %v1499_v21  ;;  %v4218_v32 = vpop.f32.mrb[38].mxu1  ;;  %v1531_v39 = vld [vmem:[#allocation2 + $0x27] sm:$0xff]  ;;  %v1361_v42 = vadd.f32 %v4171_v26, %v5058_v38  ;;  %v4173_v45 = vpop.f32.mrb[39].mxu0  ;;  %v4547_v17 = vld [vmem:[%s5874_s3 + $0x110] sm:$0xff]  }
 0x147   : > { %v1621_v37 = vld [vmem:[#allocation2 + $0x19] sm:$0xff]  ;;  %v4005_v41 = vpack.c.bf16 %v1530_v23, %v1530_v23  ;;  %v1469_v16 = vld [vmem:[#allocation2 + $0x25] sm:$0xff]  ;;  %v1454_v40 = vsel %vm5312_vm13, %v1445_v25, 0.0  ;;  %v4219_v48 = vpop.f32.mrb[39].mxu1  ;;  %1494 = vst [vmem:[#allocation3 + $0x6c] sm:$0xf] %v3995_v12  ;;  %v4010_v38 = vpack.c.bf16 %v1531_v39, %v1531_v39 }
 0x148   : > { %v1682_v6 = vld [vmem:[#allocation2 + $0x1a] sm:$0xff]  ;;  %v1500_v36 = vld [vmem:[#allocation2 + $0x26] sm:$0xff]  ;;  %v4018_v44 = vpack.c.bf16 %v1621_v37, %v1621_v37  ;;  %1463 = vst [vmem:[#allocation2 + $0x38] sm:$0xff] %v1454_v40  ;;  %1525 = vst [vmem:[#allocation3 + $0x70] sm:$0xf] %v4000_v31  ;;  %v3996_v15 = vpack.c.bf16 %v1469_v16, %v1469_v16  ;;  %v1433_v54 = vadd.f32 %v4217_v22, %v1361_v42 }
 0x149   : > { %v1713_v29 = vld [vmem:[#allocation2 + $0x1b] sm:$0xff]  ;;  %v1714_v28 = vld [vmem:[#allocation2 + $0x23] sm:$0xff]  ;;  %v4001_v51 = vpack.c.bf16 %v1500_v36, %v1500_v36  ;;  %1556 = vst [vmem:[#allocation3 + $0x74] sm:$0xf] %v4005_v41  ;;  %1586 = vst [vmem:[#allocation3 + $0x54] sm:$0xf] %v4005_v41  ;;  %v4027_v18 = vpack.c.bf16 %v1682_v6, %v1682_v6 }
 0x14a   : > { %v4032_v33 = vpack.c.bf16 %v1713_v29, %v1713_v29  ;;  %v1622_v46 = vld [vmem:[#allocation2 + $0x21] sm:$0xff]  ;;  %v4033_v53 = vpack.c.bf16 %v1714_v28, %v1714_v28  ;;  %v4531_v56 = vld [vmem:[#allocation3 + $0x4] ss:$36 sps:$4 sm:$0xff]   ;;  %1647 = vst [vmem:[#allocation3 + $0x38] sm:$0xf] %v4018_v44  ;;  %v1446_v47 = vmax.f32 %v1433_v54, 0.0 }
 0x14b   : > { %v1683_v34 = vld [vmem:[#allocation2 + $0x22] sm:$0xff]  ;;  %v4023_v49 = vpack.c.bf16 %v1622_v46, %v1622_v46  ;;  %1677 = vst [vmem:[#allocation3 + $0x18] sm:$0xf] %v4018_v44  ;;  %v4534_v58 = vld [vmem:[#allocation3 + $0x8] ss:$36 sps:$4 sm:$0xff]   ;;  %2508 = vmatprep.mubr.bf16.mxu0 %v4531_v56  ;;  %v4554_v22 = vld [vmem:[%s5874_s3 + $0x158] sm:$0xff]  }
 0x14c   : > { %1739 = vst [vmem:[#allocation3 + $0x20] sm:$0xf] %v4032_v33  ;;  %v4529_v55 = vld [vmem:[#allocation3] ss:$36 sps:$4 sm:$0xff]   ;;  %v4028_v57 = vpack.c.bf16 %v1683_v34, %v1683_v34  ;;  %1495 = vst [vmem:[#allocation3 + $0x90] sm:$0xf] %v3996_v15 }
 0x14d   : > { %1526 = vst [vmem:[#allocation3 + $0x94] sm:$0xf] %v4001_v51  ;;  %1587 = vst [vmem:[#allocation3 + $0x78] sm:$0xf] %v4010_v38  ;;  %v4536_v60 = vld [vmem:[#allocation3 + $0xc] ss:$36 sps:$4 sm:$0xff]   ;;  %2509 = vmatmul.mubr.bf16.vlgmr.msra.gmra.mrb[40].mxu0 %v4529_v55 }
 0x14e   : > { %1557 = vst [vmem:[#allocation3 + $0x98] sm:$0xf] %v4010_v38  ;;  %1708 = vst [vmem:[#allocation3 + $0x1c] sm:$0xf] %v4027_v18  ;;  %v1562_v4 = vld [vmem:[#allocation2 + $0x2f] sm:$0xff]  ;;  %v1455_v7 = vsel %vm5320_vm14, %v1446_v47, 0.0  ;;  %4290 = vmatpush3.bf16.msra.mxu0 %v4533_v43  ;;  %2564 = vmatprep.mubr.bf16.mxu1 %v4536_v60 }
 0x14f   : > { %1740 = vst [vmem:[#allocation3 + $0x44] sm:$0xf] %v4033_v53  ;;  %1678 = vst [vmem:[#allocation3 + $0x3c] sm:$0xf] %v4023_v49  ;;  %v1623_v52 = vld [vmem:[#allocation2 + $0x29] sm:$0xff]  ;;  %2565 = vmatmul.mubr.bf16.vlgmr.msra.gmra.mrb[40].mxu1 %v4534_v58  ;;  %4291 = vmatprep.subr.bf16.mxu0 %v4539_v35  ;;  %v4011_v13 = vpack.c.bf16 %v1562_v4, %v1562_v4  ;;  %v1624_v14 = vld [vmem:[#allocation2 + $0x31] sm:$0xff] }
 0x150   : > { %1709 = vst [vmem:[#allocation3 + $0x40] sm:$0xf] %v4028_v57  ;;  %1648 = vst [vmem:[#allocation3 + $0x5c] sm:$0xf] %v4023_v49  ;;  %v1684_v0 = vld [vmem:[#allocation2 + $0x2a] sm:$0xff]  ;;  %v4020_v1 = vpack.c.bf16 %v1623_v52, %v1623_v52  ;;  %v1685_v50 = vld [vmem:[#allocation2 + $0x32] sm:$0xff]  ;;  %4324 = vmatpush3.bf16.msra.mxu1 %v4538_v30  ;;  %v4025_v23 = vpack.c.bf16 %v1624_v14, %v1624_v14 }
 0x151   : > { %1619 = vst [vmem:[#allocation3 + $0xa0] sm:$0xf] %v4016_v59  ;;  %v1715_v8 = vld [vmem:[#allocation2 + $0x2b] sm:$0xff]  ;;  %1464 = vst [vmem:[#allocation2 + $0x40] sm:$0xff] %v1455_v7  ;;  %v4029_v10 = vpack.c.bf16 %v1684_v0, %v1684_v0  ;;  %v1716_v63 = vld [vmem:[#allocation2 + $0x33] sm:$0xff]  ;;  %4325 = vmatprep.subr.bf16.mxu1 %v4541_v5  ;;  %v4030_v62 = vpack.c.bf16 %v1685_v50, %v1685_v50  ;;  %v4611_v60 = vmov 0.0  }
 0x152   : > { %v4542_v9 = vld [vmem:[%s5874_s3 + $0x188] sm:$0xff]   ;;  %v4034_v19 = vpack.c.bf16 %v1715_v8, %v1715_v8  ;;  %v4543_v20 = vld [vmem:[#allocation3 + $0x4c] ss:$36 sps:$4 sm:$0xff]   ;;  %1588 = vst [vmem:[#allocation3 + $0x9c] sm:$0xf] %v4011_v13  ;;  %v4035_v25 = vpack.c.bf16 %v1716_v63, %v1716_v63  ;;  %4292 = vmatpush3.bf16.msra.mxu0 %v4540_v2  ;;  %v4559_v32 = vld [vmem:[%s5874_s3 + $0x160] sm:$0xff]  }
 0x153   : > { %v4546_v61 = vld [vmem:[#allocation3 + $0x48] ss:$36 sps:$4 sm:$0xff]   ;;  %1649 = vst [vmem:[#allocation3 + $0x80] sm:$0xf] %v4020_v1  ;;  %1679 = vst [vmem:[#allocation3 + $0x60] sm:$0xf] %v4020_v1  ;;  %2516 = vmatprep.mubr.bf16.mxu0 %v4543_v20  ;;  %4293 = vmatprep.subr.bf16.mxu0 %v4545_v11 }
 0x154   : > { %v4551_v21 = vld [vmem:[%s5874_s3 + $0x1d0] sm:$0xff]   ;;  %1710 = vst [vmem:[#allocation3 + $0x64] sm:$0xf] %v4029_v10  ;;  %v1764_v26 = vld [vmem:[#allocation3 + $0x90] sm:$0xff]  ;;  %1741 = vst [vmem:[#allocation3 + $0x68] sm:$0xf] %v4034_v19  ;;  %4326 = vmatpush3.bf16.msra.mxu1 %v4542_v9 }
 0x155   : > { %v3846_v27 = vcombine.high %v1764_v26, %v1764_v26  ;;  %v4549_v37 = vld [vmem:[#allocation3 + $0x54] ss:$36 sps:$4 sm:$0xff]   ;;  %1680 = vst [vmem:[#allocation3 + $0x84] sm:$0xf] %v4025_v23  ;;  %1711 = vst [vmem:[#allocation3 + $0x88] sm:$0xf] %v4030_v62  ;;  %2517 = vmatmul.mubr.bf16.gmra.mrb[44].mxu0 %v4546_v61  ;;  %4327 = vmatprep.subr.bf16.mxu1 %v4551_v21  ;;  %v3845_v48 = vcombine.low %v1764_v26, %v1764_v26 }
 0x156   : > { %v4552_v6 = vld [vmem:[#allocation3 + $0x50] ss:$36 sps:$4 sm:$0xff]   ;;  %1650 = vst [vmem:[#allocation3 + $0xa4] sm:$0xf] %v4025_v23  ;;  %1742 = vst [vmem:[#allocation3 + $0x8c] sm:$0xf] %v4035_v25  ;;  %2572 = vmatprep.mubr.bf16.mxu1 %v4549_v37  ;;  %4294 = vmatpush3.bf16.msra.mxu0 %v4547_v17 }
 0x157   : > { %v4553_v29 = vld [vmem:[%s5874_s3 + $0x190] sm:$0xff]   ;;  %v4556_v12 = vld [vmem:[%s5874_s3 + $0x1d8] sm:$0xff]   ;;  %2524 = vmatprep.mubr.bf16.mxu0 %v3846_v27  ;;  %2573 = vmatmul.mubr.bf16.gmra.mrb[44].mxu1 %v4552_v6  ;;  %v4565_v40 = vld [vmem:[%s5874_s3 + $0x1e0] sm:$0xff]  }
 0x158   : > { %v1655_v31 = vld [vmem:[#allocation2 + $0x39] sm:$0xff]  ;;  %4328 = vmatpush3.bf16.msra.mxu1 %v4553_v29  ;;  %4295 = vmatprep.subr.bf16.mxu0 %v4554_v22  ;;  %v4568_v46 = vld [vmem:[%s5874_s3 + $0x168] sm:$0xff]   ;;  %v4575_v18 = vld [vmem:[%s5874_s3 + $0x170] sm:$0xff]  }
 0x159   : > { %v1686_v41 = vld [vmem:[#allocation2 + $0x3a] sm:$0xff]  ;;  %v4026_v33 = vpack.c.bf16 %v1655_v31, %v1655_v31  ;;  %4329 = vmatprep.subr.bf16.mxu1 %v4556_v12  ;;  %v4573_v15 = vld [vmem:[%s5874_s3 + $0x1e8] sm:$0xff]   ;;  %v4577_v54 = vld [vmem:[%s5874_s3 + $0x1f0] sm:$0xff]  }
 0x15a   : > { %v4555_v24 = vld [vmem:[%s5874_s3 + $0x118] sm:$0xff]   ;;  %v4031_v16 = vpack.c.bf16 %v1686_v41, %v1686_v41  ;;  %v1765_v39 = vld [vmem:[#allocation3 + $0x98] sm:$0xff]  ;;  %v4572_v38 = vld [vmem:[%s5874_s3 + $0x128] sm:$0xff]  }
 0x15b   : > { %v4557_v36 = vld [vmem:[%s5874_s3 + $0x198] sm:$0xff]   ;;  %v3848_v42 = vcombine.high %v1765_v39, %v1765_v39  ;;  %1681 = vst [vmem:[#allocation3 + $0xa8] sm:$0xf] %v4026_v33  ;;  %4296 = vmatpush3.bf16.msra.mxu0 %v4555_v24  ;;  %v4561_v44 = vld [vmem:[%s5874_s3 + $0x120] sm:$0xff]   ;;  %v3847_v35 = vcombine.low %v1765_v39, %v1765_v39  ;;  %v4574_v53 = vld [vmem:[%s5874_s3 + $0x1a8] sm:$0xff]  }
 0x15c   : > { %1712 = vst [vmem:[#allocation3 + $0xac] sm:$0xf] %v4031_v16  ;;  %v1717_v43 = vld [vmem:[#allocation2 + $0x3b] sm:$0xff]  ;;  %4297 = vmatprep.subr.bf16.mxu0 %v4559_v32  ;;  %4330 = vmatpush3.bf16.msra.mxu1 %v4557_v36  ;;  %v4571_v51 = vld [vmem:[#allocation3 + $0x1c] ss:$36 sps:$4 sm:$0xff]   ;;  %v4576_v55 = vld [vmem:[%s5874_s3 + $0x130] sm:$0xff]  }
 0x15d   : > { %v4036_v45 = vpack.c.bf16 %v1717_v43, %v1717_v43  ;;  %2580 = vmatprep.mubr.bf16.mxu1 %v3848_v42  ;;  %v4564_v34 = vld [vmem:[#allocation3 + $0x14] ss:$36 sps:$4 sm:$0xff]   ;;  %2525 = vmatmul.mubr.bf16.gmra.mrb[48].mxu0 %v3845_v48  ;;  %v4578_v30 = vld [vmem:[%s5874_s3 + $0x1b0] sm:$0xff]   ;;  %v4583_v2 = vld [vmem:[#allocation3 + $0x5c] ss:$36 sps:$4 sm:$0xff]  }
 0x15e   : > { %v4567_v28 = vld [vmem:[%s5874_s3 + $0x1a0] sm:$0xff]   ;;  %4331 = vmatprep.subr.bf16.mxu1 %v4565_v40  ;;  %2620 = vmatprep.mubr.bf16.mxu0 %v4564_v34  ;;  %v4579_v56 = vld [vmem:[%s5874_s3 + $0x178] sm:$0xff]   ;;  %v4586_v4 = vld [vmem:[#allocation3 + $0x64] ss:$36 sps:$4 sm:$0xff]  }
 0x15f   : > { %1743 = vst [vmem:[#allocation3 + $0xb0] sm:$0xf] %v4036_v45  ;;  %4298 = vmatpush3.bf16.msra.mxu0 %v4561_v44  ;;  %2581 = vmatmul.mubr.bf16.gmra.mrb[48].mxu1 %v3847_v35  ;;  %v4581_v49 = vld [vmem:[%s5874_s3 + $0x1f8] sm:$0xff]   ;;  %v4585_v59 = vld [vmem:[%s5874_s3 + $0x200] sm:$0xff]   ;;  %v4588_v52 = vld [vmem:[%s5874_s3 + $0x208] sm:$0xff]  }
 0x160   : > { %4299 = vmatprep.subr.bf16.mxu0 %v4568_v46  ;;  %4332 = vmatpush3.bf16.msra.mxu1 %v4567_v28  ;;  %v4580_v57 = vld [vmem:[%s5874_s3 + $0x138] sm:$0xff]   ;;  %v4569_v5 = vld [vmem:[#allocation3 + $0x18] ss:$36 sps:$4 sm:$0xff]   ;;  %v1766_v7 = vld [vmem:[#allocation3 + $0xa0] sm:$0xff] }
 0x161   : > { %2676 = vmatprep.mubr.bf16.mxu1 %v4571_v51  ;;  %4333 = vmatprep.subr.bf16.mxu1 %v4573_v15  ;;  %v4582_v58 = vld [vmem:[%s5874_s3 + $0x1b8] sm:$0xff]   ;;  %v1761_v0 = vld [vmem:[#allocation3 + $0x7c] sm:$0xff]  ;;  %v4590_v9 = vld [vmem:[%s5874_s3 + $0x210] sm:$0xff]   ;;  %v3850_v1 = vcombine.high %v1766_v7, %v1766_v7  ;;  %v3849_v17 = vcombine.low %v1766_v7, %v1766_v7 }
 0x162   : > { %v4562_v47 = vld [vmem:[#allocation3 + $0x10] ss:$36 sps:$4 sm:$0xff]   ;;  %v1756_v8 = vld [vmem:[#allocation3 + $0x58] sm:$0xff]  ;;  %v4591_v10 = vld [vmem:[#allocation3 + $0x60] ss:$36 sps:$4 sm:$0xff]  }
 0x163   : > { %4300 = vmatpush3.bf16.msra.mxu0 %v4572_v38  ;;  %v3840_v11 = vcombine.low %v1756_v8, %v1761_v0  ;;  %v1767_v13 = vld [vmem:[#allocation3 + $0xa8] sm:$0xff]  ;;  %v4593_v50 = vld [vmem:[%s5874_s3 + $0x218] sm:$0xff]   ;;  %v4595_v63 = vld [vmem:[%s5874_s3 + $0x220] sm:$0xff]  }
 0x164   : > { %4301 = vmatprep.subr.bf16.mxu0 %v4575_v18  ;;  %4334 = vmatpush3.bf16.msra.mxu1 %v4574_v53  ;;  %v3852_v14 = vcombine.high %v1767_v13, %v1767_v13  ;;  %v3851_v19 = vcombine.low %v1767_v13, %v1767_v13  ;;  %v4597_v20 = vld [vmem:[%s5874_s3 + $0x228] sm:$0xff]   ;;  %v4598_v61 = vld [vmem:[%s5874_s3 + $0x230] sm:$0xff]   ;;  %v4599_v21 = vld [vmem:[%s5874_s3 + $0x238] sm:$0xff]  }
 0x165   : > { %4335 = vmatprep.subr.bf16.mxu1 %v4577_v54  ;;  %v4600_v23 = vld [vmem:[#allocation3 + $0x20] ss:$36 sps:$4 sm:$0xff]   ;;  %v4601_v62 = vld [vmem:[#allocation3 + $0x68] ss:$36 sps:$4 sm:$0xff]   ;;  %v2764_v26 = vld [vmem:[%s5876_s5] sm:$0xff] }
 0x166   : > { %v4602_v25 = vld [vmem:[#allocation3 + $0xb0] ss:$0 sps:$4 sm:$0xff]   ;;  %v2768_v27 = vld [vmem:[%s5876_s5 + $0x20] sm:$0xff]  ;;  %v2765_v37 = vld [vmem:[%s5876_s5 + $0x8] sm:$0xff] }
 0x167   : > { %4302 = vmatpush3.bf16.msra.mxu0 %v4576_v55  ;;  %v3926_v6 = vcombine.low %v2764_v26, %v2768_v27  ;;  %v3927_v29 = vcombine.high %v2764_v26, %v2768_v27  ;;  %v2769_v22 = vld [vmem:[%s5876_s5 + $0x28] sm:$0xff]  ;;  %v2772_v41 = vld [vmem:[%s5876_s5 + $0x40] sm:$0xff]  ;;  %v5552_v27 = vld [vmem:[%s5876_s5 + $0x10] sm:$0xff] }
 0x168   : > { %4303 = vmatprep.subr.bf16.mxu0 %v4579_v56  ;;  %4336 = vmatpush3.bf16.msra.mxu1 %v4578_v30  ;;  %v3928_v12 = vcombine.low %v2765_v37, %v2769_v22  ;;  %v3929_v31 = vcombine.high %v2765_v37, %v2769_v22  ;;  %v2776_v24 = vld [vmem:[%s5876_s5 + $0x60] sm:$0xff]  ;;  %v2773_v32 = vld [vmem:[%s5876_s5 + $0x48] sm:$0xff]  ;;  %v5557_v37 = vld [vmem:[%s5876_s5 + $0x30] sm:$0xff] }
 0x169   : > { %4337 = vmatprep.subr.bf16.mxu1 %v4581_v49  ;;  %v3934_v33 = vcombine.low %v2772_v41, %v2776_v24  ;;  %v3935_v16 = vcombine.high %v2772_v41, %v2776_v24  ;;  %v2777_v36 = vld [vmem:[%s5876_s5 + $0x68] sm:$0xff]  ;;  %v2780_v42 = vld [vmem:[%s5876_s5 + $0x80] sm:$0xff]  ;;  %v2771_v22 = vld [vmem:[%s5876_s5 + $0x38] sm:$0xff]  ;;  %v4613_v24 = vmov 0  }
 0x16a   : > { %v3936_v39 = vcombine.low %v2773_v32, %v2777_v36  ;;  %v3937_v40 = vcombine.high %v2773_v32, %v2777_v36  ;;  %v2784_v43 = vld [vmem:[%s5876_s5 + $0xa0] sm:$0xff]  ;;  %v2781_v44 = vld [vmem:[%s5876_s5 + $0x88] sm:$0xff] }
 0x16b   : > { %4304 = vmatpush3.bf16.msra.mxu0 %v4580_v57  ;;  %v3942_v45 = vcombine.low %v2780_v42, %v2784_v43  ;;  %v3943_v48 = vcombine.high %v2780_v42, %v2784_v43  ;;  %v2785_v46 = vld [vmem:[%s5876_s5 + $0xa8] sm:$0xff]  ;;  %v2788_v35 = vld [vmem:[%s5876_s5 + $0xc0] sm:$0xff] }
 0x16c   : > { %4368 = vmatprep.subr.bf16.mxu0 %v4611_v60  ;;  %4338 = vmatpush3.bf16.msra.mxu1 %v4582_v58  ;;  %v3944_v34 = vcombine.low %v2781_v44, %v2785_v46  ;;  %v3945_v28 = vcombine.high %v2781_v44, %v2785_v46  ;;  %v2792_v15 = vld [vmem:[%s5876_s5 + $0xe0] sm:$0xff]  ;;  %v2789_v51 = vld [vmem:[%s5876_s5 + $0xc8] sm:$0xff] }
 0x16d   : > { %3190 = vmatprep.subr.bf16.mxu1 %v3927_v29  ;;  %v3950_v38 = vcombine.low %v2788_v35, %v2792_v15  ;;  %v3951_v18 = vcombine.high %v2788_v35, %v2792_v15  ;;  %v2793_v53 = vld [vmem:[%s5876_s5 + $0xe8] sm:$0xff]  ;;  %v2796_v54 = vld [vmem:[%s5876_s5 + $0x100] sm:$0xff]  ;;  %v3931_v29 = vcombine.high %v5552_v27, %v5557_v37 }
 0x16e   : > { %2621 = vmatmul.mubr.bf16.vlgmr.msra.gmra.mrb[52].mxu0 %v4562_v47  ;;  %v2800_v55 = vld [vmem:[%s5876_s5 + $0x120] sm:$0xff]  ;;  %v3952_v56 = vcombine.low %v2789_v51, %v2793_v53  ;;  %v3953_v30 = vcombine.high %v2789_v51, %v2793_v53  ;;  %v2797_v57 = vld [vmem:[%s5876_s5 + $0x108] sm:$0xff] }
 0x16f   : > { %2628 = vmatprep.mubr.bf16.mxu0 %v4583_v2  ;;  %4369 = vmatpush3.bf16.msra.mxu0 %v4585_v59  ;;  %v3959_v49 = vcombine.high %v2796_v54, %v2800_v55  ;;  %v2801_v58 = vld [vmem:[%s5876_s5 + $0x128] sm:$0xff]  ;;  %v2804_v47 = vld [vmem:[%s5876_s5 + $0x140] sm:$0xff] }
 0x170   : > { %2677 = vmatmul.mubr.bf16.vlgmr.msra.gmra.mrb[52].mxu1 %v4569_v5  ;;  %4370 = vmatprep.subr.bf16.mxu0 %v4611_v60  ;;  %v3961_v59 = vcombine.high %v2797_v57, %v2801_v58  ;;  %v2805_v2 = vld [vmem:[%s5876_s5 + $0x148] sm:$0xff]  ;;  %v2816_v13 = vld [vmem:[%s5876_s5 + $0x1a0] sm:$0xff] }
 0x171   : > { %2684 = vmatprep.mubr.bf16.mxu1 %v4586_v4  ;;  %3191 = vmatpush1.bf16.msra.mxu1 %v3926_v6  ;;  %v2809_v5 = vld [vmem:[%s5876_s5 + $0x168] sm:$0xff]  ;;  %v3958_v4 = vcombine.low %v2796_v54, %v2800_v55  ;;  %v2767_v6 = vld [vmem:[%s5876_s5 + $0x18] sm:$0xff] }
 0x172   : > { %3192 = vmatprep.subr.bf16.mxu1 %v3935_v16  ;;  %v3969_v7 = vcombine.high %v2805_v2, %v2809_v5  ;;  %v5571_v41 = vcombine.high %v2767_v6, %v2771_v22 }
 0x173   : > { %4371 = vmatpush3.bf16.msra.mxu0 %v4588_v52  ;;  %v3960_v52 = vcombine.low %v2797_v57, %v2801_v58 }
 0x174   : > { %4372 = vmatprep.subr.bf16.mxu0 %v4611_v60 }
 0x175   : > { %3193 = vmatpush1.bf16.msra.mxu1 %v3934_v33  ;;  %v3826_v33 = vld [vmem:[%s5875_s4] ss:$0 sm:$0xff] }
 0x176   : > { %2629 = vmatmul.mubr.bf16.gmra.mrb[56].mxu0 %v3840_v11  ;;  %3194 = vmatprep.subr.bf16.mxu1 %v3943_v48  ;;  %v2812_v11 = vld [vmem:[%s5876_s5 + $0x180] sm:$0xff] }
 0x177   : > { %2636 = vmatprep.mubr.bf16.mxu0 %v3850_v1  ;;  %4373 = vmatpush3.bf16.msra.mxu0 %v4590_v9  ;;  %v3968_v9 = vcombine.low %v2805_v2, %v2809_v5  ;;  %v2813_v1 = vld [vmem:[%s5876_s5 + $0x188] sm:$0xff] }
 0x178   : > { %2685 = vmatmul.mubr.bf16.gmra.mrb[56].mxu1 %v4591_v10  ;;  %4374 = vmatprep.subr.bf16.mxu0 %v4611_v60  ;;  %v3975_v10 = vcombine.high %v2812_v11, %v2816_v13 }
 0x179   : > { %2692 = vmatprep.mubr.bf16.mxu1 %v3852_v14  ;;  %3195 = vmatpush1.bf16.msra.mxu1 %v3942_v45  ;;  %v2817_v14 = vld [vmem:[%s5876_s5 + $0x1a8] sm:$0xff] }
 0x17a   : > { %3196 = vmatprep.subr.bf16.mxu1 %v3951_v18 }
 0x17b   : > { %4375 = vmatpush3.bf16.msra.mxu0 %v4593_v50  ;;  %v3974_v50 = vcombine.low %v2812_v11, %v2816_v13 }
 0x17c   : > { %4376 = vmatprep.subr.bf16.mxu0 %v4611_v60 }
 0x17d   : > { %3197 = vmatpush1.bf16.msra.mxu1 %v3950_v38 }
 0x17e   : > { %2637 = vmatmul.mubr.bf16.gmra.mrb[60].mxu0 %v3849_v17  ;;  %3198 = vmatprep.subr.bf16.mxu1 %v3959_v49  ;;  %v3977_v17 = vcombine.high %v2813_v1, %v2817_v14 }
 0x17f   : > { %4377 = vmatpush3.bf16.msra.mxu0 %v4595_v63  ;;  %4384 = vmatprep.mubr.msk.bf16.mxu0 %vm4612_vm15, %v4611_v60  ;;  %v3976_v63 = vcombine.low %v2813_v1, %v2817_v14 }
 0x180   : > { %2693 = vmatmul.mubr.bf16.gmra.mrb[60].mxu1 %v3851_v19  ;;  %4378 = vmatprep.subr.bf16.mxu0 %v4611_v60  ;;  %v2820_v19 = vld [vmem:[%s5876_s5 + $0x1c0] sm:$0xff] }
 0x181   : > { %3199 = vmatpush1.bf16.msra.mxu1 %v3958_v4  ;;  %3222 = vmatprep.mubr.bf16.mxu1 %v4613_v24 }
 0x183   : > { %4379 = vmatpush3.bf16.msra.mxu0 %v4597_v20  ;;  %v2824_v20 = vld [vmem:[%s5876_s5 + $0x1e0] sm:$0xff] }
 0x184   : > { %4380 = vmatprep.subr.bf16.mxu0 %v4611_v60 }
 0x187   : > { %4381 = vmatpush3.bf16.msra.mxu0 %v4598_v61  ;;  %v2821_v61 = vld [vmem:[%s5876_s5 + $0x1c8] sm:$0xff] }
 0x188   : > { %4382 = vmatprep.subr.bf16.mxu0 %v4611_v60 }
 0x18b   : > { %4383 = vmatpush3.bf16.msra.mxu0 %v4599_v21  ;;  %v3983_v21 = vcombine.high %v2820_v19, %v2824_v20 }
 0x18c   : > { %3251 = vmatprep.subr.bf16.mxu0 %v3929_v31  ;;  %v5569_v31 = vcombine.low %v2767_v6, %v2771_v22 }
 0x18e   : > { %4385 = vmatmul.mubr.bf16.vlgmr.msra.gmra.mrb[64].mxu0 %v4600_v23  ;;  %v2825_v23 = vld [vmem:[%s5876_s5 + $0x1e8] sm:$0xff] }
 0x18f   : > { %4388 = vmatprep.mubr.msk.bf16.mxu0 %vm4612_vm15, %v4611_v60  ;;  %3252 = vmatpush1.bf16.msra.mxu0 %v3928_v12  ;;  %v3985_v26 = vcombine.high %v2821_v61, %v2825_v23  ;;  %v3930_v12 = vcombine.low %v5552_v27, %v5557_v37  ;;  %v2794_v27 = vld [vmem:[%s5876_s5 + $0xf0] sm:$0xff]  ;;  %v2791_v37 = vld [vmem:[%s5876_s5 + $0xd8] sm:$0xff] }
 0x190   : > { %3253 = vmatprep.subr.bf16.mxu0 %v3937_v40 }
 0x193   : > { %3254 = vmatpush1.bf16.msra.mxu0 %v3936_v39 }
 0x194   : > { %3255 = vmatprep.subr.bf16.mxu0 %v3945_v28 }
 0x196   : > { %4389 = vmatmul.mubr.bf16.gmra.mrb[68].mxu0 %v4601_v62  ;;  %v3982_v62 = vcombine.low %v2820_v19, %v2824_v20 }
 0x197   : > { %4392 = vmatprep.mubr.msk.bf16.mxu0 %vm4612_vm15, %v4611_v60  ;;  %3256 = vmatpush1.bf16.msra.mxu0 %v3944_v34  ;;  %v2808_v60 = vld [vmem:[%s5876_s5 + $0x160] sm:$0xff] }
 0x198   : > { %3257 = vmatprep.subr.bf16.mxu0 %v3953_v30  ;;  %v3967_v0 = vcombine.high %v2804_v47, %v2808_v60  ;;  %v3966_v8 = vcombine.low %v2804_v47, %v2808_v60 }
 0x19a   : > { %3200 = vmatprep.subr.bf16.mxu1 %v3967_v0 }
 0x19b   : > { %3258 = vmatpush1.bf16.msra.mxu0 %v3952_v56  ;;  %3201 = vmatpush1.bf16.msra.mxu1 %v3966_v8 }
 0x19c   : > { %3259 = vmatprep.subr.bf16.mxu0 %v3961_v59  ;;  %3202 = vmatprep.subr.bf16.mxu1 %v3975_v10 }
 0x19e   : > { %4393 = vmatmul.mubr.bf16.gmra.mrb[72].mxu0 %v4602_v25  ;;  %v3984_v25 = vcombine.low %v2821_v61, %v2825_v23 }
 0x19f   : > { %3260 = vmatpush1.bf16.msra.mxu0 %v3960_v52  ;;  %3203 = vmatpush1.bf16.msra.mxu1 %v3974_v50 }
 0x1a0   : > { %3261 = vmatprep.subr.bf16.mxu0 %v3969_v7  ;;  %3204 = vmatprep.subr.bf16.mxu1 %v3983_v21 }
 0x1a1   : > { %3283 = vmatprep.mubr.bf16.mxu0 %v4613_v24 }
 0x1a3   : > { %3262 = vmatpush1.bf16.msra.mxu0 %v3968_v9  ;;  %3205 = vmatpush1.bf16.msra.mxu1 %v3982_v62 }
 0x1a4   : > { %3263 = vmatprep.subr.bf16.mxu0 %v3977_v17  ;;  %3312 = vmatprep.subr.bf16.mxu1 %v3931_v29 }
 0x1a7   : > { %3264 = vmatpush1.bf16.msra.mxu0 %v3976_v63 }
 0x1a8   : > { %3265 = vmatprep.subr.bf16.mxu0 %v3985_v26 }
 0x1ab   : > { %3266 = vmatpush1.bf16.msra.mxu0 %v3984_v25 }
 0x1ac   : > { %3373 = vmatprep.subr.bf16.mxu0 %v5571_v41 }
 0x220   : > { %v4237_v32 = vpop.f32.mrb[40].mxu0 }
 0x221   : > { %v4238_v16 = vpop.f32.mrb[41].mxu0 }
 0x222   : > { %v4239_v36 = vadd.f32 %v4238_v16, %v4237_v32  ;;  %v4240_v39 = vpop.f32.mrb[42].mxu0  ;;  %v4271_v40 = vpop.f32.mrb[40].mxu1 }
 0x223   : > { %v4241_v42 = vpop.f32.mrb[43].mxu0  ;;  %v4272_v43 = vpop.f32.mrb[41].mxu1 }
 0x224   : > { %v2511_v44 = vadd.f32 %v4239_v36, %v3826_v33  ;;  %v4242_v45 = vadd.f32 %v4241_v42, %v4240_v39  ;;  %v4273_v48 = vadd.f32 %v4272_v43, %v4271_v40  ;;  %v4274_v46 = vpop.f32.mrb[42].mxu1 }
 0x225   : > { %v4275_v34 = vpop.f32.mrb[43].mxu1 }
 0x226   : > { %v2514_v28 = vadd.f32 %v4242_v45, %v3826_v33  ;;  %v2567_v35 = vadd.f32 %v4273_v48, %v2511_v44  ;;  %v4276_v15 = vadd.f32 %v4275_v34, %v4274_v46 }
 0x228   : > { %v2570_v51 = vadd.f32 %v4276_v15, %v2514_v28  ;;  %v4243_v38 = vpop.f32.mrb[44].mxu0 }
 0x229   : > { %v4244_v18 = vpop.f32.mrb[45].mxu0 }
 0x22a   : > { %v4245_v53 = vadd.f32 %v4244_v18, %v4243_v38  ;;  %v4246_v54 = vpop.f32.mrb[46].mxu0  ;;  %v4277_v55 = vpop.f32.mrb[44].mxu1 }
 0x22b   : > { %v4247_v56 = vpop.f32.mrb[47].mxu0  ;;  %v4278_v30 = vpop.f32.mrb[45].mxu1 }
 0x22c   : > { %v2519_v49 = vadd.f32 %v4245_v53, %v3826_v33  ;;  %v4248_v57 = vadd.f32 %v4247_v56, %v4246_v54  ;;  %v4279_v58 = vadd.f32 %v4278_v30, %v4277_v55  ;;  %v4280_v59 = vpop.f32.mrb[46].mxu1 }
 0x22d   : > { %v4281_v47 = vpop.f32.mrb[47].mxu1 }
 0x22e   : > { %v2522_v60 = vadd.f32 %v4248_v57, %v3826_v33  ;;  %v2575_v2 = vadd.f32 %v4279_v58, %v2519_v49  ;;  %v4282_v5 = vadd.f32 %v4281_v47, %v4280_v59 }
 0x230   : > { %v2578_v4 = vadd.f32 %v4282_v5, %v2522_v60  ;;  %v4249_v52 = vpop.f32.mrb[48].mxu0 }
 0x231   : > { %v4250_v0 = vpop.f32.mrb[49].mxu0 }
 0x232   : > { %v4251_v7 = vadd.f32 %v4250_v0, %v4249_v52  ;;  %v4252_v8 = vpop.f32.mrb[50].mxu0  ;;  %v4283_v9 = vpop.f32.mrb[48].mxu1 }
 0x233   : > { %v4253_v11 = vpop.f32.mrb[51].mxu0  ;;  %v4284_v13 = vpop.f32.mrb[49].mxu1 }
 0x234   : > { %v2527_v1 = vadd.f32 %v4251_v7, %v3826_v33  ;;  %v4285_v10 = vadd.f32 %v4284_v13, %v4283_v9  ;;  %v4286_v14 = vpop.f32.mrb[50].mxu1  ;;  %v2774_v11 = vld [vmem:[%s5876_s5 + $0x50] sm:$0xff] }
 0x235   : > { %v4287_v50 = vpop.f32.mrb[51].mxu1  ;;  %v2778_v13 = vld [vmem:[%s5876_s5 + $0x70] sm:$0xff] }
 0x236   : > { %v2583_v63 = vadd.f32 %v4285_v10, %v2527_v1  ;;  %v2775_v1 = vld [vmem:[%s5876_s5 + $0x58] sm:$0xff] }
 0x237   : > { %v2779_v10 = vld [vmem:[%s5876_s5 + $0x78] sm:$0xff] }
 0x241   : > { %v4305_v17 = vpop.f32.mrb[52].mxu0 }
 0x242   : > { %v4306_v19 = vpop.f32.mrb[53].mxu0 }
 0x243   : > { %v4307_v20 = vadd.f32 %v4306_v19, %v4305_v17  ;;  %v4308_v61 = vpop.f32.mrb[54].mxu0  ;;  %v4339_v21 = vpop.f32.mrb[52].mxu1  ;;  %v3939_v17 = vcombine.high %v2774_v11, %v2778_v13  ;;  %v5593_v19 = vcombine.high %v2775_v1, %v2779_v10 }
 0x244   : > { %v4309_v23 = vpop.f32.mrb[55].mxu0  ;;  %v4340_v62 = vpop.f32.mrb[53].mxu1 }
 0x245   : > { %v2623_v25 = vadd.f32 %v4307_v20, %v2567_v35  ;;  %v4310_v26 = vadd.f32 %v4309_v23, %v4308_v61  ;;  %v4341_v6 = vadd.f32 %v4340_v62, %v4339_v21  ;;  %v4342_v29 = vpop.f32.mrb[54].mxu1  ;;  %v2782_v20 = vld [vmem:[%s5876_s5 + $0x90] sm:$0xff]  ;;  %v2783_v23 = vld [vmem:[%s5876_s5 + $0x98] sm:$0xff] }
 0x246   : > { %v4343_v22 = vpop.f32.mrb[55].mxu1  ;;  %v2786_v21 = vld [vmem:[%s5876_s5 + $0xb0] sm:$0xff]  ;;  %v2787_v62 = vld [vmem:[%s5876_s5 + $0xb8] sm:$0xff] }
 0x247   : > { %v2626_v32 = vadd.f32 %v4310_v26, %v2570_v51  ;;  %v4344_v16 = vadd.f32 %v4343_v22, %v4342_v29  ;;  %v2679_v36 = vadd.f32 %v4341_v6, %v2623_v25  ;;  %v3938_v29 = vcombine.low %v2774_v11, %v2778_v13  ;;  %v2819_v11 = vld [vmem:[%s5876_s5 + $0x1b8] sm:$0xff] }
 0x248   : > { %v5613_v22 = vcombine.low %v2775_v1, %v2779_v10 }
 0x249   : > { %v4311_v33 = vpop.f32.mrb[56].mxu0  ;;  %v2682_v39 = vadd.f32 %v4344_v16, %v2626_v32 }
 0x24a   : > { %v4312_v40 = vpop.f32.mrb[57].mxu0 }
 0x24b   : > { %v4313_v42 = vadd.f32 %v4312_v40, %v4311_v33  ;;  %v4314_v43 = vpop.f32.mrb[58].mxu0  ;;  %v4345_v44 = vpop.f32.mrb[56].mxu1  ;;  %v5616_v33 = vcombine.high %v2783_v23, %v2787_v62 }
 0x24c   : > { %v4315_v45 = vpop.f32.mrb[59].mxu0  ;;  %v4346_v48 = vpop.f32.mrb[57].mxu1 }
 0x24d   : > { %v2631_v46 = vadd.f32 %v4313_v42, %v2575_v2  ;;  %v4316_v34 = vadd.f32 %v4315_v45, %v4314_v43  ;;  %v4347_v28 = vadd.f32 %v4346_v48, %v4345_v44  ;;  %v4348_v15 = vpop.f32.mrb[58].mxu1  ;;  %v3946_v43 = vcombine.low %v2782_v20, %v2786_v21 }
 0x24e   : > { %v4349_v35 = vpop.f32.mrb[59].mxu1  ;;  %v5633_v44 = vcombine.low %v2783_v23, %v2787_v62 }
 0x24f   : > { %v2634_v38 = vadd.f32 %v4316_v34, %v2578_v4  ;;  %v4350_v18 = vadd.f32 %v4349_v35, %v4348_v15  ;;  %v2687_v53 = vadd.f32 %v4347_v28, %v2631_v46  ;;  %v2798_v34 = vld [vmem:[%s5876_s5 + $0x110] sm:$0xff]  ;;  %v2799_v35 = vld [vmem:[%s5876_s5 + $0x118] sm:$0xff] }
 0x250   : > { %v2802_v15 = vld [vmem:[%s5876_s5 + $0x130] sm:$0xff] }
 0x251   : > { %v4317_v54 = vpop.f32.mrb[60].mxu0  ;;  %v2690_v51 = vadd.f32 %v4350_v18, %v2634_v38  ;;  %v2803_v38 = vld [vmem:[%s5876_s5 + $0x138] sm:$0xff] }
 0x252   : > { %v4318_v55 = vpop.f32.mrb[61].mxu0 }
 0x253   : > { %v4319_v56 = vadd.f32 %v4318_v55, %v4317_v54  ;;  %v4320_v30 = vpop.f32.mrb[62].mxu0  ;;  %v4351_v49 = vpop.f32.mrb[60].mxu1 }
 0x254   : > { %v4321_v57 = vpop.f32.mrb[63].mxu0  ;;  %v4352_v58 = vpop.f32.mrb[61].mxu1 }
 0x255   : > { %v2639_v59 = vadd.f32 %v4319_v56, %v2583_v63  ;;  %v4353_v47 = vadd.f32 %v4352_v58, %v4351_v49  ;;  %v4354_v60 = vpop.f32.mrb[62].mxu1  ;;  %v3963_v49 = vcombine.high %v2798_v34, %v2802_v15  ;;  %v5658_v57 = vcombine.high %v2799_v35, %v2803_v38  ;;  %v2806_v58 = vld [vmem:[%s5876_s5 + $0x150] sm:$0xff] }
 0x256   : > { %v4355_v5 = vpop.f32.mrb[63].mxu1  ;;  %v2811_v60 = vld [vmem:[%s5876_s5 + $0x178] sm:$0xff] }
 0x257   : > { %v2695_v2 = vadd.f32 %v4353_v47, %v2639_v59  ;;  %v2810_v59 = vld [vmem:[%s5876_s5 + $0x170] sm:$0xff]  ;;  %v2807_v47 = vld [vmem:[%s5876_s5 + $0x158] sm:$0xff]  ;;  %v3962_v5 = vcombine.low %v2798_v34, %v2802_v15 }
 0x258   : > { %v3970_v13 = vcombine.low %v2806_v58, %v2810_v59  ;;  %v3972_v1 = vcombine.low %v2807_v47, %v2811_v60 }
 0x261   : > { %v2734_v52 = vpop.f32.mrb[64].mxu0 }
 0x262   : > { %v2735_v0 = vadd.f32 %v2734_v52, %v2679_v36  ;;  %v4386_v7 = vpop.f32.mrb[65].mxu0  ;;  %v3947_v36 = vcombine.high %v2782_v20, %v2786_v21  ;;  %v2823_v20 = vld [vmem:[%s5876_s5 + $0x1d8] sm:$0xff] }
 0x263   : > { %v2737_v8 = vpop.f32.mrb[66].mxu0  ;;  %v3973_v7 = vcombine.high %v2807_v47, %v2811_v60 }
 0x264   : > { %v2738_v4 = vadd.f32 %v2737_v8, %v2682_v39  ;;  %v4387_v9 = vpop.f32.mrb[67].mxu0  ;;  %v2756_v14 = vmax.f32 %v2735_v0, 0.0  ;;  %v2790_v39 = vld [vmem:[%s5876_s5 + $0xd0] sm:$0xff]  ;;  %v3971_v0 = vcombine.high %v2806_v58, %v2810_v59 }
 0x265   : > { %v3955_v48 = vcombine.high %v2790_v39, %v2794_v27  ;;  %v2814_v8 = vld [vmem:[%s5876_s5 + $0x190] sm:$0xff]  ;;  %v2815_v9 = vld [vmem:[%s5876_s5 + $0x198] sm:$0xff] }
 0x266   : > { %v2757_v50 = vmax.f32 %v2738_v4, 0.0  ;;  %v2818_v4 = vld [vmem:[%s5876_s5 + $0x1b0] sm:$0xff]  ;;  %v3980_v23 = vcombine.low %v2815_v9, %v2819_v11 }
 0x267   : > { %v3979_v10 = vcombine.high %v2814_v8, %v2818_v4  ;;  %v3978_v21 = vcombine.low %v2814_v8, %v2818_v4 }
 0x268   : > { %v5591_v63 = vpack.c.bf16 %v2757_v50, %v2756_v14  ;;  %v3981_v14 = vcombine.high %v2815_v9, %v2819_v11  ;;  %v2822_v50 = vld [vmem:[%s5876_s5 + $0x1d0] sm:$0xff] }
 0x269   : > { %v2742_v61 = vpop.f32.mrb[68].mxu0 }
 0x26a   : > { %v2743_v25 = vadd.f32 %v2742_v61, %v2687_v53  ;;  %v4390_v26 = vpop.f32.mrb[69].mxu0  ;;  %3223 = vmatmul.mubr.bf16.vlgmr.msra.gmra.mrb[64].mxu1 %v5591_v63  ;;  %3284 = vmatmul.mubr.bf16.vlgmr.msra.gmra.mrb[76].mxu0 %v5591_v63  ;;  %v2827_v61 = vld [vmem:[%s5876_s5 + $0x1f8] sm:$0xff] }
 0x26b   : > { %3313 = vmatpush1.bf16.msra.mxu1 %v3930_v12  ;;  %3374 = vmatpush1.bf16.msra.mxu0 %v5569_v31  ;;  %v2745_v6 = vpop.f32.mrb[70].mxu0  ;;  %v2795_v12 = vld [vmem:[%s5876_s5 + $0xf8] sm:$0xff] }
 0x26c   : > { %v2746_v32 = vadd.f32 %v2745_v6, %v2690_v51  ;;  %v4391_v16 = vpop.f32.mrb[71].mxu0  ;;  %3314 = vmatprep.subr.bf16.mxu1 %v3939_v17  ;;  %3375 = vmatprep.subr.bf16.mxu0 %v5593_v19  ;;  %v2758_v40 = vmax.f32 %v2743_v25, 0.0  ;;  %v5638_v46 = vcombine.high %v2791_v37, %v2795_v12  ;;  %v3954_v51 = vcombine.low %v2790_v39, %v2794_v27  ;;  %v2826_v17 = vld [vmem:[%s5876_s5 + $0x1f0] sm:$0xff]  ;;  %v3438_v39 = vld [vmem:[%s4762_s26 + $0x60] sm:$0xff]  ;;  %v3439_v27 = vld [vmem:[%s4762_s26 + $0x68] sm:$0xff] }
 0x26d   : > { %3232 = vmatprep.mubr.bf16.mxu1 %v4613_v24  ;;  %3293 = vmatprep.mubr.bf16.mxu0 %v4613_v24  ;;  %v5655_v55 = vcombine.low %v2791_v37, %v2795_v12  ;;  %v3987_v62 = vcombine.high %v2822_v50, %v2826_v17  ;;  %v3989_v25 = vcombine.high %v2823_v20, %v2827_v61  ;;  %v3464_v15 = vunpack.c.l.bf16 %v3439_v27 }
 0x26e   : > { %v2759_v42 = vmax.f32 %v2746_v32, 0.0  ;;  %v3986_v26 = vcombine.low %v2822_v50, %v2826_v17  ;;  %v3988_v6 = vcombine.low %v2823_v20, %v2827_v61  ;;  %v3435_v32 = vld [vmem:[%s4762_s26 + $0x48] sm:$0xff] }
 0x26f   : > { %3315 = vmatpush1.bf16.msra.mxu1 %v3938_v29  ;;  %3376 = vmatpush1.bf16.msra.mxu0 %v5613_v22  ;;  %v2844_v29 = vsub.s32 3, %v5015_v3  ;;  %v3456_v12 = vunpack.c.l.bf16 %v3435_v32 }
 0x270   : > { %v5635_v45 = vpack.c.bf16 %v2759_v42, %v2758_v40  ;;  %3316 = vmatprep.subr.bf16.mxu1 %v3947_v36  ;;  %3377 = vmatprep.subr.bf16.mxu0 %v5616_v33 }
 0x271   : > { %v2750_v28 = vpop.f32.mrb[72].mxu0 }
 0x272   : > { %v2751_v18 = vadd.f32 %v2750_v28, %v2695_v2  ;;  %v4394_v53 = vpop.f32.mrb[73].mxu0  ;;  %3233 = vmatmul.mubr.bf16.gmra.mrb[68].mxu1 %v5635_v45  ;;  %3294 = vmatmul.mubr.bf16.gmra.mrb[80].mxu0 %v5635_v45  ;;  %v3964_v2 = vcombine.low %v2799_v35, %v2803_v38  ;;  %v3462_v28 = vunpack.c.l.bf16 %v3438_v39 }
 0x273   : > { %3317 = vmatpush1.bf16.msra.mxu1 %v3946_v43  ;;  %3378 = vmatpush1.bf16.msra.mxu0 %v5633_v44  ;;  %v2753_v54 = vpop.f32.mrb[74].mxu0 }
 0x274   : > { %v2760_v56 = vmax.f32 %v2751_v18, 0.0  ;;  %v4395_v30 = vpop.f32.mrb[75].mxu0  ;;  %3318 = vmatprep.subr.bf16.mxu1 %v3955_v48  ;;  %3379 = vmatprep.subr.bf16.mxu0 %v5638_v46  ;;  %v3463_v54 = vunpack.c.h.bf16 %v3438_v39 }
 0x275   : > { %3242 = vmatprep.mubr.bf16.mxu1 %v4613_v24  ;;  %3303 = vmatprep.mubr.bf16.mxu0 %v4613_v24 }
 0x276   : > { %v5675_v52 = vpack.c.bf16 %v2760_v56, %v2760_v56 }
 0x277   : > { %3319 = vmatpush1.bf16.msra.mxu1 %v3954_v51  ;;  %3380 = vmatpush1.bf16.msra.mxu0 %v5655_v55  ;;  %v3465_v51 = vunpack.c.h.bf16 %v3439_v27 }
 0x278   : > { %3320 = vmatprep.subr.bf16.mxu1 %v3963_v49  ;;  %3381 = vmatprep.subr.bf16.mxu0 %v5658_v57 }
 0x27a   : > { %3243 = vmatmul.mubr.bf16.gmra.mrb[72].mxu1 %v5675_v52  ;;  %3304 = vmatmul.mubr.bf16.gmra.mrb[84].mxu0 %v5675_v52 }
 0x27b   : > { %3321 = vmatpush1.bf16.msra.mxu1 %v3962_v5  ;;  %3382 = vmatpush1.bf16.msra.mxu0 %v3964_v2 }
 0x27c   : > { %3322 = vmatprep.subr.bf16.mxu1 %v3971_v0  ;;  %3383 = vmatprep.subr.bf16.mxu0 %v3973_v7 }
 0x27d   : > { %3344 = vmatprep.mubr.bf16.mxu1 %v4613_v24  ;;  %3405 = vmatprep.mubr.bf16.mxu0 %v4613_v24 }
 0x27f   : > { %3323 = vmatpush1.bf16.msra.mxu1 %v3970_v13  ;;  %3384 = vmatpush1.bf16.msra.mxu0 %v3972_v1 }
 0x280   : > { %3324 = vmatprep.subr.bf16.mxu1 %v3979_v10  ;;  %3385 = vmatprep.subr.bf16.mxu0 %v3981_v14  ;;  %v3446_v10 = vld [vmem:[%s4762_s26 + $0xa0] sm:$0xff] }
 0x283   : > { %3325 = vmatpush1.bf16.msra.mxu1 %v3978_v21  ;;  %3386 = vmatpush1.bf16.msra.mxu0 %v3980_v23 }
 0x284   : > { %3326 = vmatprep.subr.bf16.mxu1 %v3987_v62  ;;  %3387 = vmatprep.subr.bf16.mxu0 %v3989_v25 }
 0x287   : > { %3327 = vmatpush1.bf16.msra.mxu1 %v3986_v26  ;;  %3388 = vmatpush1.bf16.msra.mxu0 %v3988_v6 }
 0x288   : > { %4396 = vmatprep.subr.bf16.mxu1 %v5571_v41  ;;  %v2840_v41 = vsub.s32 2, %v5015_v3 }
 0x28a   : > { %3345 = vmatmul.mubr.bf16.vlgmr.msra.gmra.mrb[76].mxu1 %v5591_v63  ;;  %3406 = vmatmul.mubr.bf16.vlgmr.msra.gmra.mrb[88].mxu0 %v5591_v63  ;;  %v5730_v63 = vld [vmem:[%s5877_s6] sm:$0xff] }
 0x28b   : > { %4404 = vmatpush1.bf16.msra.mxu1 %v5569_v31  ;;  %3354 = vmatprep.mubr.bf16.mxu1 %v4613_v24  ;;  %v2832_v31 = vsub.s32 0, %v5015_v3  ;;  %v5740_v16 = vrot.slane %v5730_v63, %v2840_v41 }
 0x28c   : > { %4397 = vmatprep.subr.bf16.mxu1 %v5593_v19  ;;  %v2836_v19 = vsub.s32 1, %v5015_v3 }
 0x28e   : > { %v5743_v36 = vrot.slane %v5730_v63, %v2836_v19 }
 0x28f   : > { %4405 = vmatpush1.bf16.msra.mxu1 %v5613_v22  ;;  %v3434_v22 = vld [vmem:[%s4762_s26 + $0x40] sm:$0xff] }
 0x290   : > { %4398 = vmatprep.subr.bf16.mxu1 %v5616_v33  ;;  %v5746_v33 = vrot.slane %v5730_v63, %v2844_v29  ;;  %v3454_v37 = vunpack.c.l.bf16 %v3434_v22  ;;  %v3455_v43 = vunpack.c.h.bf16 %v3434_v22  ;;  %v3478_v22 = vunpack.c.l.bf16 %v3446_v10 }
 0x292   : > { %3355 = vmatmul.mubr.bf16.gmra.mrb[80].mxu1 %v5635_v45 }
 0x293   : > { %4406 = vmatpush1.bf16.msra.mxu1 %v5633_v44  ;;  %3364 = vmatprep.mubr.bf16.mxu1 %v4613_v24  ;;  %v3457_v44 = vunpack.c.h.bf16 %v3435_v32 }
 0x294   : > { %4399 = vmatprep.subr.bf16.mxu1 %v5638_v46 }
 0x297   : > { %4407 = vmatpush1.bf16.msra.mxu1 %v5655_v55 }
 0x298   : > { %4400 = vmatprep.subr.bf16.mxu1 %v5658_v57 }
 0x29a   : > { %3365 = vmatmul.mubr.bf16.gmra.mrb[84].mxu1 %v5675_v52 }
 0x29b   : > { %4408 = vmatpush1.bf16.msra.mxu1 %v3964_v2  ;;  %3415 = vmatprep.mubr.bf16.mxu1 %v4613_v24  ;;  %v3442_v2 = vld [vmem:[%s4762_s26 + $0x80] sm:$0xff] }
 0x29c   : > { %4401 = vmatprep.subr.bf16.mxu1 %v3973_v7  ;;  %v3470_v20 = vunpack.c.l.bf16 %v3442_v2  ;;  %v3471_v26 = vunpack.c.h.bf16 %v3442_v2 }
 0x29f   : > { %4409 = vmatpush1.bf16.msra.mxu1 %v3972_v1 }
 0x2a0   : > { %4402 = vmatprep.subr.bf16.mxu1 %v3981_v14  ;;  %v3447_v14 = vld [vmem:[%s4762_s26 + $0xa8] sm:$0xff] }
 0x2a1   : > { %v3480_v32 = vunpack.c.l.bf16 %v3447_v14 }
 0x2a3   : > { %4410 = vmatpush1.bf16.msra.mxu1 %v3980_v23 }
 0x2a4   : > { %4403 = vmatprep.subr.bf16.mxu1 %v3989_v25 }
 0x2a7   : > { %4411 = vmatpush1.bf16.msra.mxu1 %v3988_v6 }
 0x2aa   : > { %3416 = vmatmul.mubr.bf16.vlgmr.msra.gmra.mrb[88].mxu1 %v5635_v45 }
 0x2ab   : > { %3425 = vmatprep.mubr.bf16.mxu1 %v4613_v24  ;;  %v5737_v24 = vrot.slane %v5730_v63, %v2832_v31 }
 0x2b2   : > { %3426 = vmatmul.mubr.bf16.gmra.mrb[92].mxu1 %v5675_v52  ;;  %v3443_v52 = vld [vmem:[%s4762_s26 + $0x88] sm:$0xff] }
 0x2b3   : > { %v3472_v61 = vunpack.c.l.bf16 %v3443_v52  ;;  %v3473_v6 = vunpack.c.h.bf16 %v3443_v52 }
 0x33d   : > { %v3224_v40 = vpop.f32.mrb[64].mxu1  ;;  %v3285_v42 = vpop.f32.mrb[76].mxu0 }
 0x33e   : > { %v3225_v45 = vadd.f32 %v3224_v40, %v5737_v24  ;;  %v3286_v48 = vadd.f32 %v3285_v42, %v5740_v16  ;;  %v3226_v46 = vpop.f32.mrb[65].mxu1  ;;  %v3287_v34 = vpop.f32.mrb[77].mxu0  ;;  %v3479_v40 = vunpack.c.h.bf16 %v3446_v10  ;;  %v3481_v42 = vunpack.c.h.bf16 %v3447_v14 }
 0x33f   : > { %v3227_v35 = vadd.f32 %v3226_v46, %v5743_v36  ;;  %v3288_v38 = vadd.f32 %v3287_v34, %v5746_v33  ;;  %v3228_v18 = vpop.f32.mrb[66].mxu1  ;;  %v3289_v53 = vpop.f32.mrb[78].mxu0 }
 0x340   : > { %v3494_v55 = vadd.f32 %v3454_v37, %v3225_v45  ;;  %v3496_v56 = vadd.f32 %v3456_v12, %v3286_v48  ;;  %v3229_v30 = vadd.f32 %v3228_v18, %v5737_v24  ;;  %v3290_v49 = vadd.f32 %v3289_v53, %v5740_v16  ;;  %v3230_v57 = vpop.f32.mrb[67].mxu1  ;;  %v3291_v58 = vpop.f32.mrb[79].mxu0  ;;  %v3450_v18 = vld [vmem:[%s4762_s26 + $0xc0] sm:$0xff]  ;;  %v3451_v53 = vld [vmem:[%s4762_s26 + $0xc8] sm:$0xff] }
 0x341   : > { %v3495_v59 = vadd.f32 %v3455_v43, %v3227_v35  ;;  %v3497_v47 = vadd.f32 %v3457_v44, %v3288_v38  ;;  %v3231_v60 = vadd.f32 %v3230_v57, %v5743_v36  ;;  %v3292_v5 = vadd.f32 %v3291_v58, %v5746_v33 }
 0x342   : > { %v3534_v0 = vmax.f32 %v3494_v55, 0.0  ;;  %v3536_v7 = vmax.f32 %v3496_v56, 0.0  ;;  %v3502_v8 = vadd.f32 %v3462_v28, %v3229_v30  ;;  %v3504_v4 = vadd.f32 %v3464_v15, %v3290_v49 }
 0x343   : > { %v3535_v9 = vmax.f32 %v3495_v59, 0.0  ;;  %v3537_v11 = vmax.f32 %v3497_v47, 0.0  ;;  %v3503_v13 = vadd.f32 %v3463_v54, %v3231_v60  ;;  %v3505_v1 = vadd.f32 %v3465_v51, %v3292_v5 }
 0x344   : > { %3574 = vst [vmem:[%s5760_s12] sm:$0xff] %v3534_v0  ;;  %3576 = vst [vmem:[%s5760_s12 + $0x10] sm:$0xff] %v3536_v7  ;;  %v3542_v50 = vmax.f32 %v3502_v8, 0.0  ;;  %v3544_v17 = vmax.f32 %v3504_v4, 0.0  ;;  %v3486_v60 = vunpack.c.l.bf16 %v3450_v18  ;;  %v3488_v5 = vunpack.c.l.bf16 %v3451_v53 }
 0x345   : > { %3575 = vst [vmem:[%s5760_s12 + $0x8] sm:$0xff] %v3535_v9  ;;  %3577 = vst [vmem:[%s5760_s12 + $0x18] sm:$0xff] %v3537_v11  ;;  %v3543_v21 = vmax.f32 %v3503_v13, 0.0  ;;  %v3545_v23 = vmax.f32 %v3505_v1, 0.0  ;;  %v3234_v62 = vpop.f32.mrb[68].mxu1  ;;  %v3295_v25 = vpop.f32.mrb[80].mxu0  ;;  %v3487_v8 = vunpack.c.h.bf16 %v3450_v18  ;;  %v3489_v4 = vunpack.c.h.bf16 %v3451_v53 }
 0x346   : > { %3582 = vst [vmem:[%s5760_s12 + $0x40] sm:$0xff] %v3542_v50  ;;  %3584 = vst [vmem:[%s5760_s12 + $0x50] sm:$0xff] %v3544_v17  ;;  %v3235_v31 = vadd.f32 %v3234_v62, %v5737_v24  ;;  %v3296_v41 = vadd.f32 %v3295_v25, %v5740_v16  ;;  %v3236_v19 = vpop.f32.mrb[69].mxu1  ;;  %v3297_v29 = vpop.f32.mrb[81].mxu0 }
 0x347   : > { %3583 = vst [vmem:[%s5760_s12 + $0x48] sm:$0xff] %v3543_v21  ;;  %3585 = vst [vmem:[%s5760_s12 + $0x58] sm:$0xff] %v3545_v23  ;;  %v3237_v39 = vadd.f32 %v3236_v19, %v5743_v36  ;;  %v3298_v27 = vadd.f32 %v3297_v29, %v5746_v33  ;;  %v3238_v37 = vpop.f32.mrb[70].mxu1  ;;  %v3299_v12 = vpop.f32.mrb[82].mxu0  ;;  %v3436_v19 = vld [vmem:[%s4762_s26 + $0x50] sm:$0xff]  ;;  %v3437_v29 = vld [vmem:[%s4762_s26 + $0x58] sm:$0xff] }
 0x348   : > { %v3510_v43 = vadd.f32 %v3470_v20, %v3235_v31  ;;  %v3512_v44 = vadd.f32 %v3472_v61, %v3296_v41  ;;  %v3239_v45 = vadd.f32 %v3238_v37, %v5737_v24  ;;  %v3300_v48 = vadd.f32 %v3299_v12, %v5740_v16  ;;  %v3240_v46 = vpop.f32.mrb[71].mxu1  ;;  %v3301_v34 = vpop.f32.mrb[83].mxu0  ;;  %v3440_v37 = vld [vmem:[%s4762_s26 + $0x70] sm:$0xff]  ;;  %v3441_v12 = vld [vmem:[%s4762_s26 + $0x78] sm:$0xff] }
 0x349   : > { %v3511_v28 = vadd.f32 %v3471_v26, %v3237_v39  ;;  %v3513_v15 = vadd.f32 %v3473_v6, %v3298_v27  ;;  %v3241_v35 = vadd.f32 %v3240_v46, %v5743_v36  ;;  %v3302_v38 = vadd.f32 %v3301_v34, %v5746_v33 }
 0x34a   : > { %v3550_v54 = vmax.f32 %v3510_v43, 0.0  ;;  %v3552_v51 = vmax.f32 %v3512_v44, 0.0  ;;  %v3518_v55 = vadd.f32 %v3478_v22, %v3239_v45  ;;  %v3520_v56 = vadd.f32 %v3480_v32, %v3300_v48 }
 0x34b   : > { %v3551_v30 = vmax.f32 %v3511_v28, 0.0  ;;  %v3553_v49 = vmax.f32 %v3513_v15, 0.0  ;;  %v3519_v57 = vadd.f32 %v3479_v40, %v3241_v35  ;;  %v3521_v58 = vadd.f32 %v3481_v42, %v3302_v38 }
 0x34c   : > { %3590 = vst [vmem:[%s5760_s12 + $0x80] sm:$0xff] %v3550_v54  ;;  %3592 = vst [vmem:[%s5760_s12 + $0x90] sm:$0xff] %v3552_v51  ;;  %v3558_v59 = vmax.f32 %v3518_v55, 0.0  ;;  %v3560_v47 = vmax.f32 %v3520_v56, 0.0  ;;  %v2852_v31 = vsub.s32 5, %v5015_v3  ;;  %v2860_v41 = vsub.s32 7, %v5015_v3 }
 0x34d   : > { %3591 = vst [vmem:[%s5760_s12 + $0x88] sm:$0xff] %v3551_v30  ;;  %3593 = vst [vmem:[%s5760_s12 + $0x98] sm:$0xff] %v3553_v49  ;;  %v3559_v2 = vmax.f32 %v3519_v57, 0.0  ;;  %v3561_v52 = vmax.f32 %v3521_v58, 0.0  ;;  %v3244_v0 = vpop.f32.mrb[72].mxu1  ;;  %v3305_v7 = vpop.f32.mrb[84].mxu0  ;;  %v3458_v40 = vunpack.c.l.bf16 %v3436_v19  ;;  %v3460_v42 = vunpack.c.l.bf16 %v3437_v29 }
 0x34e   : > { %3598 = vst [vmem:[%s5760_s12 + $0xc0] sm:$0xff] %v3558_v59  ;;  %3600 = vst [vmem:[%s5760_s12 + $0xd0] sm:$0xff] %v3560_v47  ;;  %v3245_v9 = vadd.f32 %v3244_v0, %v5737_v24  ;;  %v3306_v11 = vadd.f32 %v3305_v7, %v5740_v16  ;;  %v3246_v13 = vpop.f32.mrb[73].mxu1  ;;  %v3307_v1 = vpop.f32.mrb[85].mxu0  ;;  %v5815_v39 = vrot.slane %v5730_v63, %v2852_v31  ;;  %v3459_v44 = vunpack.c.h.bf16 %v3436_v19  ;;  %v3452_v19 = vld [vmem:[%s4762_s26 + $0xd0] sm:$0xff] }
 0x34f   : > { %3599 = vst [vmem:[%s5760_s12 + $0xc8] sm:$0xff] %v3559_v2  ;;  %3601 = vst [vmem:[%s5760_s12 + $0xd8] sm:$0xff] %v3561_v52  ;;  %v3247_v10 = vadd.f32 %v3246_v13, %v5743_v36  ;;  %v3308_v14 = vadd.f32 %v3307_v1, %v5746_v33  ;;  %v3248_v50 = vpop.f32.mrb[74].mxu1  ;;  %v3309_v17 = vpop.f32.mrb[86].mxu0  ;;  %v2848_v36 = vsub.s32 4, %v5015_v3  ;;  %v2856_v33 = vsub.s32 6, %v5015_v3 }
 0x350   : > { %v3526_v20 = vadd.f32 %v3486_v60, %v3245_v9  ;;  %v3528_v61 = vadd.f32 %v3488_v5, %v3306_v11  ;;  %v3249_v21 = vpop.f32.mrb[75].mxu1  ;;  %v3310_v24 = vpop.f32.mrb[87].mxu0  ;;  %v5818_v27 = vrot.slane %v5730_v63, %v2860_v41  ;;  %v3461_v45 = vunpack.c.h.bf16 %v3437_v29  ;;  %v3444_v2 = vld [vmem:[%s4762_s26 + $0x90] sm:$0xff] }
 0x351   : > { %v3527_v16 = vadd.f32 %v3487_v8, %v3247_v10  ;;  %v3529_v23 = vadd.f32 %v3489_v4, %v3308_v14  ;;  %v5809_v22 = vrot.slane %v5730_v63, %v2848_v36  ;;  %v5812_v32 = vrot.slane %v5730_v63, %v2856_v33  ;;  %v3448_v1 = vld [vmem:[%s4762_s26 + $0xb0] sm:$0xff] }
 0x352   : > { %v3566_v62 = vmax.f32 %v3526_v20, 0.0  ;;  %v3568_v25 = vmax.f32 %v3528_v61, 0.0  ;;  %v3466_v15 = vunpack.c.l.bf16 %v3440_v37  ;;  %v3468_v35 = vunpack.c.l.bf16 %v3441_v12 }
 0x353   : > { %v3567_v26 = vmax.f32 %v3527_v16, 0.0  ;;  %v3569_v6 = vmax.f32 %v3529_v23, 0.0  ;;  %v3467_v54 = vunpack.c.h.bf16 %v3440_v37  ;;  %v3469_v51 = vunpack.c.h.bf16 %v3441_v12 }
 0x354   : > { %3606 = vst [vmem:[%s5760_s12 + $0x100] sm:$0xff] %v3566_v62  ;;  %3608 = vst [vmem:[%s5760_s12 + $0x110] sm:$0xff] %v3568_v25  ;;  %v3474_v50 = vunpack.c.l.bf16 %v3444_v2  ;;  %v3475_v21 = vunpack.c.h.bf16 %v3444_v2  ;;  %v3482_v23 = vunpack.c.l.bf16 %v3448_v1 }
 0x355   : > { %3607 = vst [vmem:[%s5760_s12 + $0x108] sm:$0xff] %v3567_v26  ;;  %3609 = vst [vmem:[%s5760_s12 + $0x118] sm:$0xff] %v3569_v6  ;;  %v3483_v26 = vunpack.c.h.bf16 %v3448_v1 }
 0x35d   : > { %v3346_v43 = vpop.f32.mrb[76].mxu1  ;;  %v3407_v3 = vpop.f32.mrb[88].mxu0 }
 0x35e   : > { %v3347_v48 = vadd.f32 %v3346_v43, %v5809_v22  ;;  %v3408_v46 = vadd.f32 %v3407_v3, %v5812_v32  ;;  %v3348_v34 = vpop.f32.mrb[77].mxu1  ;;  %v3409_v28 = vpop.f32.mrb[89].mxu0  ;;  %v3490_v43 = vunpack.c.l.bf16 %v3452_v19 }
 0x35f   : > { %v3349_v38 = vadd.f32 %v3348_v34, %v5815_v39  ;;  %v3410_v63 = vadd.f32 %v3409_v28, %v5818_v27  ;;  %v3350_v18 = vpop.f32.mrb[78].mxu1  ;;  %v3411_v53 = vpop.f32.mrb[90].mxu0 }
 0x360   : > { %v3498_v55 = vadd.f32 %v3458_v40, %v3347_v48  ;;  %v3500_v56 = vadd.f32 %v3460_v42, %v3408_v46  ;;  %v3351_v30 = vadd.f32 %v3350_v18, %v5809_v22  ;;  %v3412_v49 = vadd.f32 %v3411_v53, %v5812_v32  ;;  %v3352_v57 = vpop.f32.mrb[79].mxu1  ;;  %v3413_v58 = vpop.f32.mrb[91].mxu0  ;;  %v3445_v53 = vld [vmem:[%s4762_s26 + $0x98] sm:$0xff] }
 0x361   : > { %v3499_v59 = vadd.f32 %v3459_v44, %v3349_v38  ;;  %v3501_v47 = vadd.f32 %v3461_v45, %v3410_v63  ;;  %v3353_v60 = vadd.f32 %v3352_v57, %v5815_v39  ;;  %v3414_v5 = vadd.f32 %v3413_v58, %v5818_v27 }
 0x362   : > { %v3538_v52 = vmax.f32 %v3498_v55, 0.0  ;;  %v3540_v0 = vmax.f32 %v3500_v56, 0.0  ;;  %v3506_v7 = vadd.f32 %v3466_v15, %v3351_v30  ;;  %v3508_v8 = vadd.f32 %v3468_v35, %v3412_v49 }
 0x363   : > { %v3539_v4 = vmax.f32 %v3499_v59, 0.0  ;;  %v3541_v9 = vmax.f32 %v3501_v47, 0.0  ;;  %v3507_v11 = vadd.f32 %v3467_v54, %v3353_v60  ;;  %v3509_v13 = vadd.f32 %v3469_v51, %v3414_v5  ;;  %v3449_v54 = vld [vmem:[%s4762_s26 + $0xb8] sm:$0xff] }
 0x364   : > { %3578 = vst [vmem:[%s5760_s12 + $0x20] sm:$0xff] %v3538_v52  ;;  %3580 = vst [vmem:[%s5760_s12 + $0x30] sm:$0xff] %v3540_v0  ;;  %v3546_v10 = vmax.f32 %v3506_v7, 0.0  ;;  %v3548_v14 = vmax.f32 %v3508_v8, 0.0  ;;  %v3491_v45 = vunpack.c.h.bf16 %v3452_v19  ;;  %v3476_v51 = vunpack.c.l.bf16 %v3445_v53  ;;  %v3453_v52 = vld [vmem:[%s4762_s26 + $0xd8] sm:$0xff] }
 0x365   : > { %3579 = vst [vmem:[%s5760_s12 + $0x28] sm:$0xff] %v3539_v4  ;;  %3581 = vst [vmem:[%s5760_s12 + $0x38] sm:$0xff] %v3541_v9  ;;  %v3547_v17 = vmax.f32 %v3507_v11, 0.0  ;;  %v3549_v20 = vmax.f32 %v3509_v13, 0.0  ;;  %v3356_v61 = vpop.f32.mrb[80].mxu1  ;;  %v3477_v56 = vunpack.c.h.bf16 %v3445_v53  ;;  %v3484_v49 = vunpack.c.l.bf16 %v3449_v54 }
 0x366   : > { %3586 = vst [vmem:[%s5760_s12 + $0x60] sm:$0xff] %v3546_v10  ;;  %3588 = vst [vmem:[%s5760_s12 + $0x70] sm:$0xff] %v3548_v14  ;;  %v3357_v24 = vadd.f32 %v3356_v61, %v5809_v22  ;;  %v3358_v16 = vpop.f32.mrb[81].mxu1  ;;  %v3485_v58 = vunpack.c.h.bf16 %v3449_v54  ;;  %v3492_v11 = vunpack.c.l.bf16 %v3453_v52  ;;  %v3493_v10 = vunpack.c.h.bf16 %v3453_v52 }
 0x367   : > { %3587 = vst [vmem:[%s5760_s12 + $0x68] sm:$0xff] %v3547_v17  ;;  %3589 = vst [vmem:[%s5760_s12 + $0x78] sm:$0xff] %v3549_v20  ;;  %v3359_v62 = vadd.f32 %v3358_v16, %v5815_v39  ;;  %v3360_v25 = vpop.f32.mrb[82].mxu1 }
 0x368   : > { %v3514_v6 = vadd.f32 %v3474_v50, %v3357_v24  ;;  %v3361_v36 = vadd.f32 %v3360_v25, %v5809_v22  ;;  %v3362_v33 = vpop.f32.mrb[83].mxu1 }
 0x369   : > { %v3515_v31 = vadd.f32 %v3475_v21, %v3359_v62  ;;  %v3363_v41 = vadd.f32 %v3362_v33, %v5815_v39 }
 0x36a   : > { %v3554_v29 = vmax.f32 %v3514_v6, 0.0  ;;  %v3522_v37 = vadd.f32 %v3482_v23, %v3361_v36 }
 0x36b   : > { %v3555_v12 = vmax.f32 %v3515_v31, 0.0  ;;  %v3523_v40 = vadd.f32 %v3483_v26, %v3363_v41 }
 0x36c   : > { %3594 = vst [vmem:[%s5760_s12 + $0xa0] sm:$0xff] %v3554_v29  ;;  %v3562_v42 = vmax.f32 %v3522_v37, 0.0 }
 0x36d   : > { %3595 = vst [vmem:[%s5760_s12 + $0xa8] sm:$0xff] %v3555_v12  ;;  %v3563_v3 = vmax.f32 %v3523_v40, 0.0  ;;  %v3366_v44 = vpop.f32.mrb[84].mxu1 }
 0x36e   : > { %3602 = vst [vmem:[%s5760_s12 + $0xe0] sm:$0xff] %v3562_v42  ;;  %v3367_v48 = vadd.f32 %v3366_v44, %v5809_v22  ;;  %v3368_v46 = vpop.f32.mrb[85].mxu1 }
 0x36f   : > { %3603 = vst [vmem:[%s5760_s12 + $0xe8] sm:$0xff] %v3563_v3  ;;  %v3369_v34 = vadd.f32 %v3368_v46, %v5815_v39  ;;  %v3370_v28 = vpop.f32.mrb[86].mxu1 }
 0x370   : > { %v3530_v15 = vadd.f32 %v3490_v43, %v3367_v48  ;;  %v3371_v35 = vpop.f32.mrb[87].mxu1 }
 0x371   : > { %v3531_v38 = vadd.f32 %v3491_v45, %v3369_v34 }
 0x372   : > { %v3570_v63 = vmax.f32 %v3530_v15, 0.0 }
 0x373   : > { %v3571_v18 = vmax.f32 %v3531_v38, 0.0 }
 0x374   : > { %3610 = vst [vmem:[%s5760_s12 + $0x120] sm:$0xff] %v3570_v63 }
 0x375   : > { %3611 = vst [vmem:[%s5760_s12 + $0x128] sm:$0xff] %v3571_v18 }
 0x37d   : > { %v3417_v55 = vpop.f32.mrb[88].mxu1 }
 0x37e   : > { %v3418_v22 = vadd.f32 %v3417_v55, %v5812_v32  ;;  %v3419_v30 = vpop.f32.mrb[89].mxu1 }
 0x37f   : > { %v3420_v39 = vadd.f32 %v3419_v30, %v5818_v27  ;;  %v3421_v57 = vpop.f32.mrb[90].mxu1 }
 0x380   : > { %v3516_v59 = vadd.f32 %v3476_v51, %v3418_v22  ;;  %v3422_v47 = vadd.f32 %v3421_v57, %v5812_v32  ;;  %v3423_v60 = vpop.f32.mrb[91].mxu1 }
 0x381   : > { %v3517_v5 = vadd.f32 %v3477_v56, %v3420_v39  ;;  %v3424_v2 = vadd.f32 %v3423_v60, %v5818_v27 }
 0x382   : > { %v3556_v0 = vmax.f32 %v3516_v59, 0.0  ;;  %v3524_v7 = vadd.f32 %v3484_v49, %v3422_v47 }
 0x383   : > { %v3557_v8 = vmax.f32 %v3517_v5, 0.0  ;;  %v3525_v4 = vadd.f32 %v3485_v58, %v3424_v2 }
 0x384   : > { %3596 = vst [vmem:[%s5760_s12 + $0xb0] sm:$0xff] %v3556_v0  ;;  %v3564_v9 = vmax.f32 %v3524_v7, 0.0 }
 0x385   : > { %3597 = vst [vmem:[%s5760_s12 + $0xb8] sm:$0xff] %v3557_v8  ;;  %v3565_v13 = vmax.f32 %v3525_v4, 0.0  ;;  %v3427_v1 = vpop.f32.mrb[92].mxu1 }
 0x386   : > { %3604 = vst [vmem:[%s5760_s12 + $0xf0] sm:$0xff] %v3564_v9  ;;  %v3428_v14 = vadd.f32 %v3427_v1, %v5812_v32  ;;  %v3429_v50 = vpop.f32.mrb[93].mxu1 }
 0x387   : > { %3605 = vst [vmem:[%s5760_s12 + $0xf8] sm:$0xff] %v3565_v13  ;;  %v3430_v17 = vadd.f32 %v3429_v50, %v5818_v27  ;;  %v3431_v20 = vpop.f32.mrb[94].mxu1 }
 0x388   : > { %v3532_v61 = vadd.f32 %v3492_v11, %v3428_v14  ;;  %v3432_v21 = vpop.f32.mrb[95].mxu1 }
 0x389   : > { %v3533_v24 = vadd.f32 %v3493_v10, %v3430_v17 }
 0x38a   : > { %v3572_v16 = vmax.f32 %v3532_v61, 0.0 }
 0x38b   : > { %v3573_v23 = vmax.f32 %v3533_v24, 0.0 }
 0x38c   : > { %3612 = vst [vmem:[%s5760_s12 + $0x130] sm:$0xff] %v3572_v16 }
 0x38d   : > { %3613 = vst [vmem:[%s5760_s12 + $0x138] sm:$0xff] %v3573_v23 }
 0x38e PF: > { %s17_s24 = sadd.s32 1, %s4609_s24  }
 0x38f   : > { %p14_p4 = scmp.ge.s32.totalorder %s17_s24, 4  }
 0x391   :  { %16 = sbr.rel (!%p14_p4) target bundleno = 1 (0x1), region = 78 }

</bundles_post_ra>
